<compile_context>
chip_gen: v6e
topology: v6e:2x2x1
jax: 0.10.0
libtpu: 0.0.40
codegen_flags: <defaults>
</compile_context>

<pallas_src>
import functools

import numpy as np
import jax
import jax.numpy as jnp
from jax.experimental import pallas as pl
from jax.experimental.pallas import tpu as pltpu


# ------------------------------------------------------------------------------------------
# DFT-matrix helper: cos/sin parts of kron(eye(n_blocks), DFT_n), scaled (ortho norm folded in)
# ------------------------------------------------------------------------------------------
def _block_diag_dft(n, n_blocks, scale):
    k = np.arange(n)
    ang = 2.0 * np.pi * np.outer(k, k) / n
    eye = np.eye(n_blocks, dtype=np.float64)
    c = np.kron(eye, np.cos(ang) * scale)
    s = np.kron(eye, np.sin(ang) * scale)
    return jnp.asarray(c, jnp.float32), jnp.asarray(s, jnp.float32)


# ------------------------------------------------------------------------------------------
# Stage 1: bandwidth-bound streaming accumulation over the batch
# ------------------------------------------------------------------------------------------
def _accum_kernel(o_ref, l_ref, d_ref, sq_ref):
    # o_ref/l_ref: (Nb, C*H, W) slab of this step; d_ref/sq_ref: (C*H, W) per-core resident
    # output accumulators (their block index is constant along the "arbitrary" axis).
    @pl.when(pl.program_id(1) == 0)
    def _():
        d_ref[...] = jnp.zeros_like(d_ref)
        sq_ref[...] = jnp.zeros_like(sq_ref)

    d = o_ref[...].astype(jnp.float32) - l_ref[...].astype(jnp.float32)
    # Reductions over the leading (non-lane/sublane) axis are pure VPU vector adds.
    d_ref[...] += jnp.sum(d, axis=0)
    sq_ref[...] += jnp.sum(d * d, axis=0)


# ------------------------------------------------------------------------------------------
# Stage 2: one-shot finalize (block-DFT matmuls + FFL weighting + RMSE)
# ------------------------------------------------------------------------------------------
def _finalize_kernel(dpart_ref, sqpart_ref, bwc_ref, bws_ref, bhc_ref, bhs_ref, out_ref, *,
                     C, H, inv_total, inv_n2, inv_spec, fdl_scale):
    ones11 = jnp.ones((1, 1), jnp.float32)

    d_sum = jnp.sum(dpart_ref[...], axis=0)        # (C*H, W)  sum over core chunks
    sq_sum = jnp.sum(sqpart_ref[...], axis=0)      # (C*H, W)

    # RMSE = sqrt(mean((o - l)^2))
    rmse = jnp.sqrt(jnp.sum(sq_sum) * inv_total * ones11)          # (1, 1)

    # ---- per-patch 2-D DFT (norm='ortho') of sum_n (o_n - l_n) ----
    # column pass along W:  T = d @ (Cw - i*Sw),  Cw/Sw = kron(eye(pf), DFT_pw)
    bwc = bwc_ref[...]
    bws = bws_ref[...]
    tr = jnp.dot(d_sum, bwc, preferred_element_type=jnp.float32)
    ti = -jnp.dot(d_sum, bws, preferred_element_type=jnp.float32)

    # row pass along H, per channel:  F_c = (Ch - i*Sh) @ T_c,  Ch/Sh = kron(eye(pf), DFT_ph)
    bhc = bhc_ref[...]
    bhs = bhs_ref[...]
    fds = []
    for c in range(C):                              # C is small; unrolled at trace time
        trc = tr[c * H:(c + 1) * H, :]
        tic = ti[c * H:(c + 1) * H, :]
        frc = (jnp.dot(bhc, trc, preferred_element_type=jnp.float32)
               + jnp.dot(bhs, tic, preferred_element_type=jnp.float32))
        fic = (jnp.dot(bhc, tic, preferred_element_type=jnp.float32)
               - jnp.dot(bhs, trc, preferred_element_type=jnp.float32))
        # |mean_n F(o_n) - mean_n F(l_n)|^2 == |F(sum_n (o_n - l_n))|^2 / N^2
        fds.append((frc * frc + fic * fic) * inv_n2)

    # FFL weight (alpha==2): log(fd+1) / global max, nan->0, clip [0,1]; loss = mean(w * fd).
    logs = [jnp.log(fd + 1.0) for fd in fds]
    mmax = logs[0]
    for m in logs[1:]:
        mmax = jnp.maximum(mmax, m)
    gmax = jnp.max(mmax)                            # global max (batch_matrix=True)

    wacc = jnp.zeros_like(fds[0])
    for fd, m in zip(fds, logs):
        w = m / gmax
        w = jnp.where(jnp.isnan(w), 0.0, w)
        w = jnp.clip(w, 0.0, 1.0)
        wacc = wacc + w * fd

    fdl = jnp.sum(wacc) * inv_spec * ones11         # mean over the whole spectrum
    out_ref[...] = rmse + fdl_scale * fdl


# ------------------------------------------------------------------------------------------
# Wrapper
# ------------------------------------------------------------------------------------------
def loss_rmse_fdl(outputs, label, *, patch_factor=4, fdl_loss_weight=0.7,
                  alpha_outer=0.7, block_batch=None):
    assert outputs.shape == label.shape and outputs.ndim == 4
    N, C, H, W = outputs.shape
    pf = patch_factor
    assert H % pf == 0 and W % pf == 0
    ph, pw = H // pf, W // pf
    CH = C * H

    # Free, contiguous reshape: NCHW -> (N, C*H, W); W stays on the lane axis.
    o2 = outputs.reshape(N, CH, W)
    l2 = label.reshape(N, CH, W)

    # ---- batch partitioning: G core-chunks (v7x has 2 TensorCores) x steps x Nb samples ----
    G = 2 if (N % 2 == 0 and N >= 2) else 1
    per_core = N // G
    slab_budget = 16 << 20                                     # double-buffered input slabs
    nb_cap = max(1, slab_budget // (2 * 2 * CH * W * 4))
    if block_batch is not None:
        nb_cap = min(nb_cap, max(1, int(block_batch)))
    Nb = 1
    for cand in range(min(per_core, nb_cap), 0, -1):
        if per_core % cand == 0:
            Nb = cand
            break
    steps = per_core // Nb

    # ---- stage 1: stream the batch, accumulate sum(o-l) and sum((o-l)^2) per core chunk ----
    acc_bytes = 2 * 2 * CH * W * 4                             # two resident (C*H, W) outputs
    vmem1 = 2 * 2 * Nb * CH * W * 4 + acc_bytes + (4 << 20)
    vmem1 = int(min(max(vmem1, 16 << 20), 64 << 20))
    cost1 = pl.CostEstimate(flops=5 * N * CH * W, transcendentals=0,
                            bytes_accessed=4 * (2 * N * CH * W + 2 * G * CH * W))

    d_part, sq_part = pl.pallas_call(
        _accum_kernel,
        out_shape=(jax.ShapeDtypeStruct((G, CH, W), jnp.float32),
                   jax.ShapeDtypeStruct((G, CH, W), jnp.float32)),
        grid_spec=pltpu.PrefetchScalarGridSpec(
            num_scalar_prefetch=0,
            grid=(G, steps),
            in_specs=[
                pl.BlockSpec((Nb, CH, W), lambda g, n: (g * steps + n, 0, 0)),
                pl.BlockSpec((Nb, CH, W), lambda g, n: (g * steps + n, 0, 0)),
            ],
            out_specs=(
                pl.BlockSpec((None, CH, W), lambda g, n: (g, 0, 0)),
                pl.BlockSpec((None, CH, W), lambda g, n: (g, 0, 0)),
            ),
        ),
        compiler_params=pltpu.CompilerParams(
            dimension_semantics=("parallel", "arbitrary"),
            vmem_limit_bytes=vmem1),
        cost_estimate=cost1,
    )(o2, l2)

    # ---- stage 2: one-shot DFT + FFL weighting + RMSE -> scalar ----
    bwc, bws = _block_diag_dft(pw, pf, 1.0 / np.sqrt(pw))      # (W, W) column-pass DFT
    bhc, bhs = _block_diag_dft(ph, pf, 1.0 / np.sqrt(ph))      # (H, H) per-channel row-pass DFT

    vmem2 = (2 * (2 * G * CH * W + 2 * W * W + 2 * H * H) + 10 * CH * W) * 4 + (4 << 20)
    vmem2 = int(min(max(vmem2, 16 << 20), 64 << 20))
    cost2 = pl.CostEstimate(
        flops=4 * CH * W * W + 8 * C * H * H * W + 16 * CH * W,
        transcendentals=CH * W + 2,
        bytes_accessed=4 * (2 * G * CH * W + 2 * W * W + 2 * H * H + 1))

    kernel2 = functools.partial(
        _finalize_kernel, C=C, H=H,
        inv_total=1.0 / float(N * C * H * W),                  # RMSE mean
        inv_n2=1.0 / float(N * N),                             # (sum/N)^2 deferred scaling
        inv_spec=1.0 / float(C * H * W),                       # mean over all frequencies
        fdl_scale=float(alpha_outer) * float(fdl_loss_weight), # outer 0.7 * FFL loss_weight 0.7
    )

    out = pl.pallas_call(
        kernel2,
        out_shape=jax.ShapeDtypeStruct((1, 1), jnp.float32),
        grid_spec=pltpu.PrefetchScalarGridSpec(
            num_scalar_prefetch=0,
            grid=(1,),
            in_specs=[
                pl.BlockSpec((G, CH, W), lambda i: (0, 0, 0)),
                pl.BlockSpec((G, CH, W), lambda i: (0, 0, 0)),
                pl.BlockSpec((W, W), lambda i: (0, 0)),
                pl.BlockSpec((W, W), lambda i: (0, 0)),
                pl.BlockSpec((H, H), lambda i: (0, 0)),
                pl.BlockSpec((H, H), lambda i: (0, 0)),
            ],
            out_specs=pl.BlockSpec((1, 1), lambda i: (0, 0)),
        ),
        compiler_params=pltpu.CompilerParams(
            dimension_semantics=("arbitrary",),
            vmem_limit_bytes=vmem2),
        cost_estimate=cost2,
    )(d_part, sq_part, bwc, bws, bhc, bhs)

    return out[0, 0]


# ------------------------------------------------------------------------------------------
# Pure-JAX reference (mirrors the PyTorch module) for a correctness check
# ------------------------------------------------------------------------------------------
def loss_rmse_fdl_reference(outputs, label, *, patch_factor=4,
                            fdl_loss_weight=0.7, alpha_outer=0.7):
    N, C, H, W = outputs.shape
    pf = patch_factor
    ph, pw = H // pf, W // pf
    o = outputs.astype(jnp.float32)
    l = label.astype(jnp.float32)

    def to_freq(x):
        x = x.reshape(N, C, pf, ph, pf, pw)
        x = jnp.transpose(x, (0, 2, 4, 1, 3, 5)).reshape(N, pf * pf, C, ph, pw)
        f = jnp.fft.fft2(x, norm="ortho")
        return jnp.stack([f.real, f.imag], axis=-1)

    pfreq = jnp.mean(to_freq(o), axis=0, keepdims=True)
    tfreq = jnp.mean(to_freq(l), axis=0, keepdims=True)
    diff2 = (pfreq - tfreq) ** 2
    fd = diff2[..., 0] + diff2[..., 1]
    m = jnp.log(fd + 1.0)
    m = m / jnp.max(m)
    m = jnp.where(jnp.isnan(m), 0.0, m)
    m = jnp.clip(m, 0.0, 1.0)
    ffl = jnp.mean(m * fd) * fdl_loss_weight
    rmse = jnp.sqrt(jnp.mean((o - l) ** 2))
    return rmse + alpha_outer * ffl


if __name__ == "__main__":
    def run_case(shape, block_batch=None):
        k1, k2 = jax.random.split(jax.random.PRNGKey(0))
        outputs = jax.random.normal(k1, shape, dtype=jnp.float32)
        label = jax.random.normal(k2, shape, dtype=jnp.float32)
        got = jax.jit(functools.partial(loss_rmse_fdl, block_batch=block_batch))(outputs, label)
        want = jax.jit(loss_rmse_fdl_reference)(outputs, label)
        got, want = jax.block_until_ready((got, want))
        assert got.shape == () and bool(jnp.isfinite(got)), got
        assert bool(jnp.allclose(got, want, rtol=1e-2, atol=1e-3)), (float(got), float(want))

    run_case((2, 4, 16, 16))                   # G=2 core chunks, 1 accumulation step each
    run_case((4, 4, 16, 16), block_batch=1)    # G=2 core chunks, 2 accumulation steps each
    print("KERNEL_OK")
</pallas_src>

<mosaic_0001>
module attributes {stable_mosaic.version = 11 : i64} {
  func.func @_accum_kernel(%arg0: i32, %arg1: i32, %arg2: memref<1x64x16xf32, #tpu.memory_space<vmem>>, %arg3: memref<1x64x16xf32, #tpu.memory_space<vmem>>, %arg4: memref<1x64x16xf32, #tpu.memory_space<vmem>>, %arg5: memref<1x64x16xf32, #tpu.memory_space<vmem>>) attributes {dimension_semantics = [#tpu.dimension_semantics<parallel>, #tpu.dimension_semantics<arbitrary>], iteration_bounds = array<i64: 2, 1>, scalar_prefetch = 0 : i64, scratch_operands = 0 : i64, tpu.core_type = #tpu.core_type<tc>, window_params = [{transform_indices = @transform_0, window_bounds = array<i64: 1, 64, 16>}, {transform_indices = @transform_1, window_bounds = array<i64: 1, 64, 16>}, {transform_indices = @transform_2, window_bounds = array<i64: 1, 64, 16>}, {transform_indices = @transform_3, window_bounds = array<i64: 1, 64, 16>}]} {
    %c0_i32 = arith.constant 0 : i32
    %0 = arith.cmpi eq, %arg1, %c0_i32 : i32
    %1 = arith.extui %0 : i1 to i32
    %c0_i32_0 = arith.constant 0 : i32
    %2 = arith.cmpi ne, %1, %c0_i32_0 : i32
    scf.if %2 {
      %cst_19 = arith.constant 0.000000e+00 : f32
      %21 = vector.broadcast %cst_19 : f32 to vector<64x16xf32>
      %c0_20 = arith.constant 0 : index
      %c0_21 = arith.constant 0 : index
      %c0_22 = arith.constant 0 : index
      %22 = vector.load %arg4[%c0_20, %c0_21, %c0_22] : memref<1x64x16xf32, #tpu.memory_space<vmem>>, vector<1x64x16xf32>
      %23 = vector.shape_cast %22 : vector<1x64x16xf32> to vector<64x16xf32>
      %24 = vector.shape_cast %21 : vector<64x16xf32> to vector<1x64x16xf32>
      tpu.vector_store %arg4[%c0_20, %c0_21, %c0_22], %24 {strides = array<i32>} : memref<1x64x16xf32, #tpu.memory_space<vmem>>, vector<1x64x16xf32>,
      %cst_23 = arith.constant 0.000000e+00 : f32
      %25 = vector.broadcast %cst_23 : f32 to vector<64x16xf32>
      %c0_24 = arith.constant 0 : index
      %c0_25 = arith.constant 0 : index
      %c0_26 = arith.constant 0 : index
      %26 = vector.load %arg5[%c0_24, %c0_25, %c0_26] : memref<1x64x16xf32, #tpu.memory_space<vmem>>, vector<1x64x16xf32>
      %27 = vector.shape_cast %26 : vector<1x64x16xf32> to vector<64x16xf32>
      %28 = vector.shape_cast %25 : vector<64x16xf32> to vector<1x64x16xf32>
      tpu.vector_store %arg5[%c0_24, %c0_25, %c0_26], %28 {strides = array<i32>} : memref<1x64x16xf32, #tpu.memory_space<vmem>>, vector<1x64x16xf32>,
    } else {
    }
    %c0 = arith.constant 0 : index
    %c0_1 = arith.constant 0 : index
    %c0_2 = arith.constant 0 : index
    %3 = vector.load %arg2[%c0, %c0_1, %c0_2] : memref<1x64x16xf32, #tpu.memory_space<vmem>>, vector<1x64x16xf32>
    %c0_3 = arith.constant 0 : index
    %c0_4 = arith.constant 0 : index
    %c0_5 = arith.constant 0 : index
    %4 = vector.load %arg3[%c0_3, %c0_4, %c0_5] : memref<1x64x16xf32, #tpu.memory_space<vmem>>, vector<1x64x16xf32>
    %5 = arith.subf %3, %4 : vector<1x64x16xf32>
    %c0_6 = arith.constant 0 : index
    %c0_7 = arith.constant 0 : index
    %c0_8 = arith.constant 0 : index
    %6 = vector.load %arg4[%c0_6, %c0_7, %c0_8] : memref<1x64x16xf32, #tpu.memory_space<vmem>>, vector<1x64x16xf32>
    %7 = vector.shape_cast %6 : vector<1x64x16xf32> to vector<64x16xf32>
    %cst = arith.constant dense<0.000000e+00> : vector<64x16xf32>
    %8 = vector.multi_reduction <add>, %5, %cst [0] : vector<1x64x16xf32> to vector<64x16xf32>
    %9 = arith.addf %7, %8 : vector<64x16xf32>
    %c0_9 = arith.constant 0 : index
    %c0_10 = arith.constant 0 : index
    %c0_11 = arith.constant 0 : index
    %10 = vector.load %arg4[%c0_9, %c0_10, %c0_11] : memref<1x64x16xf32, #tpu.memory_space<vmem>>, vector<1x64x16xf32>
    %11 = vector.shape_cast %10 : vector<1x64x16xf32> to vector<64x16xf32>
    %12 = vector.shape_cast %9 : vector<64x16xf32> to vector<1x64x16xf32>
    tpu.vector_store %arg4[%c0_9, %c0_10, %c0_11], %12 {strides = array<i32>} : memref<1x64x16xf32, #tpu.memory_space<vmem>>, vector<1x64x16xf32>,
    %c0_12 = arith.constant 0 : index
    %c0_13 = arith.constant 0 : index
    %c0_14 = arith.constant 0 : index
    %13 = vector.load %arg5[%c0_12, %c0_13, %c0_14] : memref<1x64x16xf32, #tpu.memory_space<vmem>>, vector<1x64x16xf32>
    %14 = vector.shape_cast %13 : vector<1x64x16xf32> to vector<64x16xf32>
    %15 = arith.mulf %5, %5 : vector<1x64x16xf32>
    %cst_15 = arith.constant dense<0.000000e+00> : vector<64x16xf32>
    %16 = vector.multi_reduction <add>, %15, %cst_15 [0] : vector<1x64x16xf32> to vector<64x16xf32>
    %17 = arith.addf %14, %16 : vector<64x16xf32>
    %c0_16 = arith.constant 0 : index
    %c0_17 = arith.constant 0 : index
    %c0_18 = arith.constant 0 : index
    %18 = vector.load %arg5[%c0_16, %c0_17, %c0_18] : memref<1x64x16xf32, #tpu.memory_space<vmem>>, vector<1x64x16xf32>
    %19 = vector.shape_cast %18 : vector<1x64x16xf32> to vector<64x16xf32>
    %20 = vector.shape_cast %17 : vector<64x16xf32> to vector<1x64x16xf32>
    tpu.vector_store %arg5[%c0_16, %c0_17, %c0_18], %20 {strides = array<i32>} : memref<1x64x16xf32, #tpu.memory_space<vmem>>, vector<1x64x16xf32>,
    return
  }
  func.func @transform_0(%arg0: i32, %arg1: i32) -> (i32, i32, i32) {
    %c1_i32 = arith.constant 1 : i32
    %0 = arith.muli %arg0, %c1_i32 : i32
    %1 = arith.addi %0, %arg1 : i32
    %c0_i32 = arith.constant 0 : i32
    %c0_i32_0 = arith.constant 0 : i32
    %c0_i32_1 = arith.constant 0 : i32
    return %1, %c0_i32, %c0_i32_0 : i32, i32, i32
  }
  func.func @transform_1(%arg0: i32, %arg1: i32) -> (i32, i32, i32) {
    %c1_i32 = arith.constant 1 : i32
    %0 = arith.muli %arg0, %c1_i32 : i32
    %1 = arith.addi %0, %arg1 : i32
    %c0_i32 = arith.constant 0 : i32
    %c0_i32_0 = arith.constant 0 : i32
    %c0_i32_1 = arith.constant 0 : i32
    return %1, %c0_i32, %c0_i32_0 : i32, i32, i32
  }
  func.func @transform_2(%arg0: i32, %arg1: i32) -> (i32, i32, i32) {
    %c0_i32 = arith.constant 0 : i32
    %c0_i32_0 = arith.constant 0 : i32
    %c0_i32_1 = arith.constant 0 : i32
    return %arg0, %c0_i32, %c0_i32_0 : i32, i32, i32
  }
  func.func @transform_3(%arg0: i32, %arg1: i32) -> (i32, i32, i32) {
    %c0_i32 = arith.constant 0 : i32
    %c0_i32_0 = arith.constant 0 : i32
    %c0_i32_1 = arith.constant 0 : i32
    return %arg0, %c0_i32, %c0_i32_0 : i32, i32, i32
  }
}

module attributes {stable_mosaic.version = 11 : i64} {
  func.func @_finalize_kernel(%arg0: i32, %arg1: memref<2x64x16xf32, #tpu.memory_space<vmem>>, %arg2: memref<2x64x16xf32, #tpu.memory_space<vmem>>, %arg3: memref<16x16xf32, #tpu.memory_space<vmem>>, %arg4: memref<16x16xf32, #tpu.memory_space<vmem>>, %arg5: memref<16x16xf32, #tpu.memory_space<vmem>>, %arg6: memref<16x16xf32, #tpu.memory_space<vmem>>, %arg7: memref<1x1xf32, #tpu.memory_space<vmem>>) attributes {dimension_semantics = [#tpu.dimension_semantics<arbitrary>], iteration_bounds = array<i64: 1>, scalar_prefetch = 0 : i64, scratch_operands = 0 : i64, tpu.core_type = #tpu.core_type<tc>, window_params = [{pipeline_mode = #tpu.pipeline_mode<synchronous>, transform_indices = @transform_0, window_bounds = array<i64: 2, 64, 16>}, {pipeline_mode = #tpu.pipeline_mode<synchronous>, transform_indices = @transform_1, window_bounds = array<i64: 2, 64, 16>}, {pipeline_mode = #tpu.pipeline_mode<synchronous>, transform_indices = @transform_2, window_bounds = array<i64: 16, 16>}, {pipeline_mode = #tpu.pipeline_mode<synchronous>, transform_indices = @transform_3, window_bounds = array<i64: 16, 16>}, {pipeline_mode = #tpu.pipeline_mode<synchronous>, transform_indices = @transform_4, window_bounds = array<i64: 16, 16>}, {pipeline_mode = #tpu.pipeline_mode<synchronous>, transform_indices = @transform_5, window_bounds = array<i64: 16, 16>}, {pipeline_mode = #tpu.pipeline_mode<synchronous>, transform_indices = @transform_6, window_bounds = array<i64: 1, 1>}]} {
    %cst = arith.constant 1.000000e+00 : f32
    %0 = vector.broadcast %cst : f32 to vector<1x1xf32>
    %c0 = arith.constant 0 : index
    %c0_0 = arith.constant 0 : index
    %c0_1 = arith.constant 0 : index
    %1 = vector.load %arg1[%c0, %c0_0, %c0_1] : memref<2x64x16xf32, #tpu.memory_space<vmem>>, vector<2x64x16xf32>
    %cst_2 = arith.constant dense<0.000000e+00> : vector<64x16xf32>
    %2 = vector.multi_reduction <add>, %1, %cst_2 [0] : vector<2x64x16xf32> to vector<64x16xf32>
    %c0_3 = arith.constant 0 : index
    %c0_4 = arith.constant 0 : index
    %c0_5 = arith.constant 0 : index
    %3 = vector.load %arg2[%c0_3, %c0_4, %c0_5] : memref<2x64x16xf32, #tpu.memory_space<vmem>>, vector<2x64x16xf32>
    %cst_6 = arith.constant dense<0.000000e+00> : vector<64x16xf32>
    %4 = vector.multi_reduction <add>, %3, %cst_6 [0] : vector<2x64x16xf32> to vector<64x16xf32>
    %5 = vector.shape_cast %4 : vector<64x16xf32> to vector<1x64x16xf32>
    %cst_7 = arith.constant dense<0.000000e+00> : vector<1xf32>
    %6 = vector.multi_reduction <add>, %5, %cst_7 [1, 2] : vector<1x64x16xf32> to vector<1xf32>
    %7 = vector.shape_cast %6 : vector<1xf32> to vector<1x1x1xf32>
    %8 = vector.extract %7[0, 0, 0] : f32 from vector<1x1x1xf32>
    %cst_8 = arith.constant 4.8828125E-4 : f32
    %9 = arith.mulf %8, %cst_8 : f32
    %10 = vector.broadcast %9 : f32 to vector<1x1xf32>
    %11 = arith.mulf %10, %0 : vector<1x1xf32>
    %12 = math.sqrt %11 : vector<1x1xf32>
    %c0_9 = arith.constant 0 : index
    %c0_10 = arith.constant 0 : index
    %13 = vector.load %arg3[%c0_9, %c0_10] : memref<16x16xf32, #tpu.memory_space<vmem>>, vector<16x16xf32>
    %c0_11 = arith.constant 0 : index
    %c0_12 = arith.constant 0 : index
    %14 = vector.load %arg4[%c0_11, %c0_12] : memref<16x16xf32, #tpu.memory_space<vmem>>, vector<16x16xf32>
    %cst_13 = arith.constant dense<0.000000e+00> : vector<64x16xf32>
    %15 = tpu.matmul %2, %13, %cst_13 {dimension_numbers = #tpu.dot_dimension_numbers<[1], [0], [0], [1], [0, 0, 1, 1], [], []>} : vector<64x16xf32>, vector<16x16xf32>, vector<64x16xf32> -> vector<64x16xf32>
    %cst_14 = arith.constant dense<0.000000e+00> : vector<64x16xf32>
    %16 = tpu.matmul %2, %14, %cst_14 {dimension_numbers = #tpu.dot_dimension_numbers<[1], [0], [0], [1], [0, 0, 1, 1], [], []>} : vector<64x16xf32>, vector<16x16xf32>, vector<64x16xf32> -> vector<64x16xf32>
    %cst_15 = arith.constant 0.000000e+00 : f32
    %17 = vector.broadcast %cst_15 : f32 to vector<64x16xf32>
    %18 = arith.subf %17, %16 : vector<64x16xf32>
    %c0_16 = arith.constant 0 : index
    %c0_17 = arith.constant 0 : index
    %19 = vector.load %arg5[%c0_16, %c0_17] : memref<16x16xf32, #tpu.memory_space<vmem>>, vector<16x16xf32>
    %c0_18 = arith.constant 0 : index
    %c0_19 = arith.constant 0 : index
    %20 = vector.load %arg6[%c0_18, %c0_19] : memref<16x16xf32, #tpu.memory_space<vmem>>, vector<16x16xf32>
    %21 = vector.extract_strided_slice %15 {offsets = [0, 0], sizes = [16, 16], strides = [1, 1]} : vector<64x16xf32> to vector<16x16xf32>
    %22 = vector.extract_strided_slice %18 {offsets = [0, 0], sizes = [16, 16], strides = [1, 1]} : vector<64x16xf32> to vector<16x16xf32>
    %cst_20 = arith.constant dense<0.000000e+00> : vector<16x16xf32>
    %23 = tpu.matmul %19, %21, %cst_20 {dimension_numbers = #tpu.dot_dimension_numbers<[1], [0], [0], [1], [0, 0, 1, 1], [], []>} : vector<16x16xf32>, vector<16x16xf32>, vector<16x16xf32> -> vector<16x16xf32>
    %cst_21 = arith.constant dense<0.000000e+00> : vector<16x16xf32>
    %24 = tpu.matmul %20, %22, %cst_21 {dimension_numbers = #tpu.dot_dimension_numbers<[1], [0], [0], [1], [0, 0, 1, 1], [], []>} : vector<16x16xf32>, vector<16x16xf32>, vector<16x16xf32> -> vector<16x16xf32>
    %25 = arith.addf %23, %24 : vector<16x16xf32>
    %cst_22 = arith.constant dense<0.000000e+00> : vector<16x16xf32>
    %26 = tpu.matmul %19, %22, %cst_22 {dimension_numbers = #tpu.dot_dimension_numbers<[1], [0], [0], [1], [0, 0, 1, 1], [], []>} : vector<16x16xf32>, vector<16x16xf32>, vector<16x16xf32> -> vector<16x16xf32>
    %cst_23 = arith.constant dense<0.000000e+00> : vector<16x16xf32>
    %27 = tpu.matmul %20, %21, %cst_23 {dimension_numbers = #tpu.dot_dimension_numbers<[1], [0], [0], [1], [0, 0, 1, 1], [], []>} : vector<16x16xf32>, vector<16x16xf32>, vector<16x16xf32> -> vector<16x16xf32>
    %28 = arith.subf %26, %27 : vector<16x16xf32>
    %29 = arith.mulf %25, %25 : vector<16x16xf32>
    %30 = arith.mulf %28, %28 : vector<16x16xf32>
    %31 = arith.addf %29, %30 : vector<16x16xf32>
    %cst_24 = arith.constant 2.500000e-01 : f32
    %32 = vector.broadcast %cst_24 : f32 to vector<16x16xf32>
    %33 = arith.mulf %31, %32 : vector<16x16xf32>
    %34 = vector.extract_strided_slice %15 {offsets = [16, 0], sizes = [16, 16], strides = [1, 1]} : vector<64x16xf32> to vector<16x16xf32>
    %35 = vector.extract_strided_slice %18 {offsets = [16, 0], sizes = [16, 16], strides = [1, 1]} : vector<64x16xf32> to vector<16x16xf32>
    %cst_25 = arith.constant dense<0.000000e+00> : vector<16x16xf32>
    %36 = tpu.matmul %19, %34, %cst_25 {dimension_numbers = #tpu.dot_dimension_numbers<[1], [0], [0], [1], [0, 0, 1, 1], [], []>} : vector<16x16xf32>, vector<16x16xf32>, vector<16x16xf32> -> vector<16x16xf32>
    %cst_26 = arith.constant dense<0.000000e+00> : vector<16x16xf32>
    %37 = tpu.matmul %20, %35, %cst_26 {dimension_numbers = #tpu.dot_dimension_numbers<[1], [0], [0], [1], [0, 0, 1, 1], [], []>} : vector<16x16xf32>, vector<16x16xf32>, vector<16x16xf32> -> vector<16x16xf32>
    %38 = arith.addf %36, %37 : vector<16x16xf32>
    %cst_27 = arith.constant dense<0.000000e+00> : vector<16x16xf32>
    %39 = tpu.matmul %19, %35, %cst_27 {dimension_numbers = #tpu.dot_dimension_numbers<[1], [0], [0], [1], [0, 0, 1, 1], [], []>} : vector<16x16xf32>, vector<16x16xf32>, vector<16x16xf32> -> vector<16x16xf32>
    %cst_28 = arith.constant dense<0.000000e+00> : vector<16x16xf32>
    %40 = tpu.matmul %20, %34, %cst_28 {dimension_numbers = #tpu.dot_dimension_numbers<[1], [0], [0], [1], [0, 0, 1, 1], [], []>} : vector<16x16xf32>, vector<16x16xf32>, vector<16x16xf32> -> vector<16x16xf32>
    %41 = arith.subf %39, %40 : vector<16x16xf32>
    %42 = arith.mulf %38, %38 : vector<16x16xf32>
    %43 = arith.mulf %41, %41 : vector<16x16xf32>
    %44 = arith.addf %42, %43 : vector<16x16xf32>
    %cst_29 = arith.constant 2.500000e-01 : f32
    %45 = vector.broadcast %cst_29 : f32 to vector<16x16xf32>
    %46 = arith.mulf %44, %45 : vector<16x16xf32>
    %47 = vector.extract_strided_slice %15 {offsets = [32, 0], sizes = [16, 16], strides = [1, 1]} : vector<64x16xf32> to vector<16x16xf32>
    %48 = vector.extract_strided_slice %18 {offsets = [32, 0], sizes = [16, 16], strides = [1, 1]} : vector<64x16xf32> to vector<16x16xf32>
    %cst_30 = arith.constant dense<0.000000e+00> : vector<16x16xf32>
    %49 = tpu.matmul %19, %47, %cst_30 {dimension_numbers = #tpu.dot_dimension_numbers<[1], [0], [0], [1], [0, 0, 1, 1], [], []>} : vector<16x16xf32>, vector<16x16xf32>, vector<16x16xf32> -> vector<16x16xf32>
    %cst_31 = arith.constant dense<0.000000e+00> : vector<16x16xf32>
    %50 = tpu.matmul %20, %48, %cst_31 {dimension_numbers = #tpu.dot_dimension_numbers<[1], [0], [0], [1], [0, 0, 1, 1], [], []>} : vector<16x16xf32>, vector<16x16xf32>, vector<16x16xf32> -> vector<16x16xf32>
    %51 = arith.addf %49, %50 : vector<16x16xf32>
    %cst_32 = arith.constant dense<0.000000e+00> : vector<16x16xf32>
    %52 = tpu.matmul %19, %48, %cst_32 {dimension_numbers = #tpu.dot_dimension_numbers<[1], [0], [0], [1], [0, 0, 1, 1], [], []>} : vector<16x16xf32>, vector<16x16xf32>, vector<16x16xf32> -> vector<16x16xf32>
    %cst_33 = arith.constant dense<0.000000e+00> : vector<16x16xf32>
    %53 = tpu.matmul %20, %47, %cst_33 {dimension_numbers = #tpu.dot_dimension_numbers<[1], [0], [0], [1], [0, 0, 1, 1], [], []>} : vector<16x16xf32>, vector<16x16xf32>, vector<16x16xf32> -> vector<16x16xf32>
    %54 = arith.subf %52, %53 : vector<16x16xf32>
    %55 = arith.mulf %51, %51 : vector<16x16xf32>
    %56 = arith.mulf %54, %54 : vector<16x16xf32>
    %57 = arith.addf %55, %56 : vector<16x16xf32>
    %cst_34 = arith.constant 2.500000e-01 : f32
    %58 = vector.broadcast %cst_34 : f32 to vector<16x16xf32>
    %59 = arith.mulf %57, %58 : vector<16x16xf32>
    %60 = vector.extract_strided_slice %15 {offsets = [48, 0], sizes = [16, 16], strides = [1, 1]} : vector<64x16xf32> to vector<16x16xf32>
    %61 = vector.extract_strided_slice %18 {offsets = [48, 0], sizes = [16, 16], strides = [1, 1]} : vector<64x16xf32> to vector<16x16xf32>
    %cst_35 = arith.constant dense<0.000000e+00> : vector<16x16xf32>
    %62 = tpu.matmul %19, %60, %cst_35 {dimension_numbers = #tpu.dot_dimension_numbers<[1], [0], [0], [1], [0, 0, 1, 1], [], []>} : vector<16x16xf32>, vector<16x16xf32>, vector<16x16xf32> -> vector<16x16xf32>
    %cst_36 = arith.constant dense<0.000000e+00> : vector<16x16xf32>
    %63 = tpu.matmul %20, %61, %cst_36 {dimension_numbers = #tpu.dot_dimension_numbers<[1], [0], [0], [1], [0, 0, 1, 1], [], []>} : vector<16x16xf32>, vector<16x16xf32>, vector<16x16xf32> -> vector<16x16xf32>
    %64 = arith.addf %62, %63 : vector<16x16xf32>
    %cst_37 = arith.constant dense<0.000000e+00> : vector<16x16xf32>
    %65 = tpu.matmul %19, %61, %cst_37 {dimension_numbers = #tpu.dot_dimension_numbers<[1], [0], [0], [1], [0, 0, 1, 1], [], []>} : vector<16x16xf32>, vector<16x16xf32>, vector<16x16xf32> -> vector<16x16xf32>
    %cst_38 = arith.constant dense<0.000000e+00> : vector<16x16xf32>
    %66 = tpu.matmul %20, %60, %cst_38 {dimension_numbers = #tpu.dot_dimension_numbers<[1], [0], [0], [1], [0, 0, 1, 1], [], []>} : vector<16x16xf32>, vector<16x16xf32>, vector<16x16xf32> -> vector<16x16xf32>
    %67 = arith.subf %65, %66 : vector<16x16xf32>
    %68 = arith.mulf %64, %64 : vector<16x16xf32>
    %69 = arith.mulf %67, %67 : vector<16x16xf32>
    %70 = arith.addf %68, %69 : vector<16x16xf32>
    %cst_39 = arith.constant 2.500000e-01 : f32
    %71 = vector.broadcast %cst_39 : f32 to vector<16x16xf32>
    %72 = arith.mulf %70, %71 : vector<16x16xf32>
    %cst_40 = arith.constant 1.000000e+00 : f32
    %73 = vector.broadcast %cst_40 : f32 to vector<16x16xf32>
    %74 = arith.addf %33, %73 : vector<16x16xf32>
    %75 = math.log %74 : vector<16x16xf32>
    %cst_41 = arith.constant 1.000000e+00 : f32
    %76 = vector.broadcast %cst_41 : f32 to vector<16x16xf32>
    %77 = arith.addf %46, %76 : vector<16x16xf32>
    %78 = math.log %77 : vector<16x16xf32>
    %cst_42 = arith.constant 1.000000e+00 : f32
    %79 = vector.broadcast %cst_42 : f32 to vector<16x16xf32>
    %80 = arith.addf %59, %79 : vector<16x16xf32>
    %81 = math.log %80 : vector<16x16xf32>
    %cst_43 = arith.constant 1.000000e+00 : f32
    %82 = vector.broadcast %cst_43 : f32 to vector<16x16xf32>
    %83 = arith.addf %72, %82 : vector<16x16xf32>
    %84 = math.log %83 : vector<16x16xf32>
    %85 = arith.maximumf %75, %78 : vector<16x16xf32>
    %86 = arith.maximumf %85, %81 : vector<16x16xf32>
    %87 = arith.maximumf %86, %84 : vector<16x16xf32>
    %88 = vector.shape_cast %87 : vector<16x16xf32> to vector<1x16x16xf32>
    %cst_44 = arith.constant dense<0xFF800000> : vector<1xf32>
    %89 = vector.multi_reduction <maximumf>, %88, %cst_44 [1, 2] : vector<1x16x16xf32> to vector<1xf32>
    %90 = vector.shape_cast %89 : vector<1xf32> to vector<1x1x1xf32>
    %91 = vector.extract %90[0, 0, 0] : f32 from vector<1x1x1xf32>
    %cst_45 = arith.constant 0.000000e+00 : f32
    %92 = vector.broadcast %cst_45 : f32 to vector<16x16xf32>
    %93 = vector.broadcast %91 : f32 to vector<16x16xf32>
    %94 = arith.divf %75, %93 : vector<16x16xf32>
    %95 = arith.cmpf one, %94, %94 : vector<16x16xf32>
    %cst_46 = arith.constant 0.000000e+00 : f32
    %96 = vector.broadcast %cst_46 : f32 to vector<16x16xf32>
    %97 = arith.select %95, %96, %94 : vector<16x16xi1>, vector<16x16xf32>
    %cst_47 = arith.constant 0.000000e+00 : f32
    %cst_48 = arith.constant 1.000000e+00 : f32
    %98 = vector.broadcast %cst_47 : f32 to vector<16x16xf32>
    %99 = arith.maximumf %98, %97 : vector<16x16xf32>
    %100 = vector.broadcast %cst_48 : f32 to vector<16x16xf32>
    %101 = arith.minimumf %100, %99 : vector<16x16xf32>
    %102 = arith.mulf %101, %33 : vector<16x16xf32>
    %103 = arith.addf %92, %102 : vector<16x16xf32>
    %104 = vector.broadcast %91 : f32 to vector<16x16xf32>
    %105 = arith.divf %78, %104 : vector<16x16xf32>
    %106 = arith.cmpf one, %105, %105 : vector<16x16xf32>
    %cst_49 = arith.constant 0.000000e+00 : f32
    %107 = vector.broadcast %cst_49 : f32 to vector<16x16xf32>
    %108 = arith.select %106, %107, %105 : vector<16x16xi1>, vector<16x16xf32>
    %cst_50 = arith.constant 0.000000e+00 : f32
    %cst_51 = arith.constant 1.000000e+00 : f32
    %109 = vector.broadcast %cst_50 : f32 to vector<16x16xf32>
    %110 = arith.maximumf %109, %108 : vector<16x16xf32>
    %111 = vector.broadcast %cst_51 : f32 to vector<16x16xf32>
    %112 = arith.minimumf %111, %110 : vector<16x16xf32>
    %113 = arith.mulf %112, %46 : vector<16x16xf32>
    %114 = arith.addf %103, %113 : vector<16x16xf32>
    %115 = vector.broadcast %91 : f32 to vector<16x16xf32>
    %116 = arith.divf %81, %115 : vector<16x16xf32>
    %117 = arith.cmpf one, %116, %116 : vector<16x16xf32>
    %cst_52 = arith.constant 0.000000e+00 : f32
    %118 = vector.broadcast %cst_52 : f32 to vector<16x16xf32>
    %119 = arith.select %117, %118, %116 : vector<16x16xi1>, vector<16x16xf32>
    %cst_53 = arith.constant 0.000000e+00 : f32
    %cst_54 = arith.constant 1.000000e+00 : f32
    %120 = vector.broadcast %cst_53 : f32 to vector<16x16xf32>
    %121 = arith.maximumf %120, %119 : vector<16x16xf32>
    %122 = vector.broadcast %cst_54 : f32 to vector<16x16xf32>
    %123 = arith.minimumf %122, %121 : vector<16x16xf32>
    %124 = arith.mulf %123, %59 : vector<16x16xf32>
    %125 = arith.addf %114, %124 : vector<16x16xf32>
    %126 = vector.broadcast %91 : f32 to vector<16x16xf32>
    %127 = arith.divf %84, %126 : vector<16x16xf32>
    %128 = arith.cmpf one, %127, %127 : vector<16x16xf32>
    %cst_55 = arith.constant 0.000000e+00 : f32
    %129 = vector.broadcast %cst_55 : f32 to vector<16x16xf32>
    %130 = arith.select %128, %129, %127 : vector<16x16xi1>, vector<16x16xf32>
    %cst_56 = arith.constant 0.000000e+00 : f32
    %cst_57 = arith.constant 1.000000e+00 : f32
    %131 = vector.broadcast %cst_56 : f32 to vector<16x16xf32>
    %132 = arith.maximumf %131, %130 : vector<16x16xf32>
    %133 = vector.broadcast %cst_57 : f32 to vector<16x16xf32>
    %134 = arith.minimumf %133, %132 : vector<16x16xf32>
    %135 = arith.mulf %134, %72 : vector<16x16xf32>
    %136 = arith.addf %125, %135 : vector<16x16xf32>
    %137 = vector.shape_cast %136 : vector<16x16xf32> to vector<1x16x16xf32>
    %cst_58 = arith.constant dense<0.000000e+00> : vector<1xf32>
    %138 = vector.multi_reduction <add>, %137, %cst_58 [1, 2] : vector<1x16x16xf32> to vector<1xf32>
    %139 = vector.shape_cast %138 : vector<1xf32> to vector<1x1x1xf32>
    %140 = vector.extract %139[0, 0, 0] : f32 from vector<1x1x1xf32>
    %cst_59 = arith.constant 9.765625E-4 : f32
    %141 = arith.mulf %140, %cst_59 : f32
    %142 = vector.broadcast %141 : f32 to vector<1x1xf32>
    %143 = arith.mulf %142, %0 : vector<1x1xf32>
    %cst_60 = arith.constant 4.900000e-01 : f32
    %144 = vector.broadcast %cst_60 : f32 to vector<1x1xf32>
    %145 = arith.mulf %144, %143 : vector<1x1xf32>
    %146 = arith.addf %12, %145 : vector<1x1xf32>
    %c0_61 = arith.constant 0 : index
    %c0_62 = arith.constant 0 : index
    %147 = vector.load %arg7[%c0_61, %c0_62] : memref<1x1xf32, #tpu.memory_space<vmem>>, vector<1x1xf32>
    tpu.vector_store %arg7[%c0_61, %c0_62], %146 {strides = array<i32>} : memref<1x1xf32, #tpu.memory_space<vmem>>, vector<1x1xf32>,
    return
  }
  func.func @transform_0(%arg0: i32) -> (i32, i32, i32) {
    %c0_i32 = arith.constant 0 : i32
    %c0_i32_0 = arith.constant 0 : i32
    %c0_i32_1 = arith.constant 0 : i32
    %c0_i32_2 = arith.constant 0 : i32
    return %c0_i32, %c0_i32_0, %c0_i32_1 : i32, i32, i32
  }
  func.func @transform_1(%arg0: i32) -> (i32, i32, i32) {
    %c0_i32 = arith.constant 0 : i32
    %c0_i32_0 = arith.constant 0 : i32
    %c0_i32_1 = arith.constant 0 : i32
    %c0_i32_2 = arith.constant 0 : i32
    return %c0_i32, %c0_i32_0, %c0_i32_1 : i32, i32, i32
  }
  func.func @transform_2(%arg0: i32) -> (i32, i32) {
    %c0_i32 = arith.constant 0 : i32
    %c0_i32_0 = arith.constant 0 : i32
    %c0_i32_1 = arith.constant 0 : i32
    return %c0_i32, %c0_i32_0 : i32, i32
  }
  func.func @transform_3(%arg0: i32) -> (i32, i32) {
    %c0_i32 = arith.constant 0 : i32
    %c0_i32_0 = arith.constant 0 : i32
    %c0_i32_1 = arith.constant 0 : i32
    return %c0_i32, %c0_i32_0 : i32, i32
  }
  func.func @transform_4(%arg0: i32) -> (i32, i32) {
    %c0_i32 = arith.constant 0 : i32
    %c0_i32_0 = arith.constant 0 : i32
    %c0_i32_1 = arith.constant 0 : i32
    return %c0_i32, %c0_i32_0 : i32, i32
  }
  func.func @transform_5(%arg0: i32) -> (i32, i32) {
    %c0_i32 = arith.constant 0 : i32
    %c0_i32_0 = arith.constant 0 : i32
    %c0_i32_1 = arith.constant 0 : i32
    return %c0_i32, %c0_i32_0 : i32, i32
  }
  func.func @transform_6(%arg0: i32) -> (i32, i32) {
    %c0_i32 = arith.constant 0 : i32
    %c0_i32_0 = arith.constant 0 : i32
    %c0_i32_1 = arith.constant 0 : i32
    return %c0_i32, %c0_i32_0 : i32, i32
  }
}

</mosaic_0001>

<bundles_post_ra>
// kernel: loss_rmse_fdl.2
= control target key start
LH: loop header
LB: loop body
LE: loop exit
PB: predicated region body
PF: predicated region fallthrough
CT: control target
= control target key end

     0   :  { %9 = vsyncpa [#allocation3], 0  ;;  %s971_s0 = inlined_call_operand.hbm [shape: f32[2,64,16], index: 0, kind: input, shape index: {}]   ;;  %s972_s1 = inlined_call_operand.hbm [shape: f32[2,64,16], index: 1, kind: input, shape index: {}]   ;;  %s973_s2 = inlined_call_operand.vmem [shape: f32[2,64,16], index: 2, kind: output, shape index: {0}]   ;;  %s974_s3 = inlined_call_operand.vmem [shape: f32[2,64,16], index: 3, kind: output, shape index: {1}]  }
   0x1   :  { %11 = vsyncpa [#allocation3 + $0x1], 0 }
   0x2   :  { %12 = vsyncpa [#allocation5], 0 }
   0x3   :  { %14 = vsyncpa [#allocation5 + $0x1], 0  ;;  %s738_s12 = smov 0   ;;  %s740_s13 = smov 0  }
   0x4   :  { %s742_s14 = smov 0   ;;  %s744_s15 = smov 0  }
   0x5   :  { %s746_s16 = smov 0   ;;  %s748_s17 = smov 0  }
   0x6 LB: > { %s515_s18 = sadd.s32 4294967295, %s711_s17   ;;  %s32_s19 = sadd.s32 1, %s707_s16  ;;  %s711_s17 = sphi %s748_s17, %s20_s17   ;;  %s707_s16 = sphi %s746_s16, %s983_s16   ;;  %s703_s15 = sphi %s744_s15, %s982_s15   ;;  %s699_s14 = sphi %s742_s14, %s981_s14   ;;  %s695_s13 = sphi %s740_s13, %s980_s13   ;;  %s691_s12 = sphi %s738_s12, %s979_s12  }
   0x7   : > { %p34_p0 = scmp.ge.s32.totalorder %s32_s19, 2  ;;  %s41_s20 = sadd.s32 1, %s699_s14 }
   0x8   : > { %p48_p1 = scmp.ne.s32.totalorder %s699_s14, %s695_s13  ;;  %p49_p2 = scmp.eq.s32.totalorder %s711_s17, 0 }
   0x9   : > { %s985_s19 = smov (%p34_p0, %s32_s19), 0  ;;  %p54_p4 = scmp.ne.s32.totalorder %s695_s13, %s691_s12 }
   0xa   : > { %p774_p3 = por %p49_p2, %p48_p1  ;;  %s38_s22 = ssub.s32 %s707_s16, %s985_s19 }
   0xb   : > { %p55_p5 = scmp.eq.s32.totalorder %s515_s18, 0  ;;  %p39_p6 = scmp.eq.s32.totalorder %s38_s22, 0 }
   0xc   : > { %p549_p8 = scmp.lt.s32.totalorder %s711_s17, 2  ;;  %s790_s25 = sand.u32 1, %s699_s14  }
   0xd   : > { %p781_p7 = por %p55_p5, %p54_p4  ;;  %s534_s26 = sshll.u32 %s707_s16, 10 }
   0xe   : > { %s787_s24 = scalar_select %p39_p6, %s699_s14, %s41_s20  }
   0xf   : > { %s519_s27 = sshll.u32 %s790_s25, 6  ;;  %s169_s30 = scalar_lea.hbm %s971_s0, %s534_s26 }
  0x10   : > { %s162_s4 = scalar_lea.vmem [#allocation2], %s519_s27  ;;  %p801_p9 = pnand %p549_p8, %p774_p3 }
  0x11   : > { %s170_s5 = sshll.u32 %s162_s4, 4  ;;  %s159_s7 = scalar_lea.sflag [#allocation3], %s790_s25  ;;  %s171_s5 = int_to_ptr.vmem [resolvable:$true] %s170_s5 }
  0x12   : > { %p603_p10 = pneg %p801_p9  ;;  %s614_s8 = scalar_lea.vmem %s171_s5, 1024 }
  0x13   : > { %p615_p11 = scmp.ne.s32.totalorder %s171_s5, %s614_s8  ;;  %s713_s9 = smov [#allocation2]  }
  0x14   : > { %s619_s10 = sshll.u32 %s713_s9, 4  ;;  %s620_s10 = int_to_ptr.vmem [resolvable:$false] %s619_s10 }
  0x15   : > { %p617_p12 = pnand %p615_p11, %p603_p10  ;;  %s621_s11 = scalar_lea.vmem %s620_s10, 2048 }
  0x16   : > { %p622_p0 = scmp.lt.s32.totalorder %s171_s5, %s620_s10  ;;  %p623_p1 = scmp.lt.s32.totalorder %s621_s11, %s614_s8 }
  0x17   : > { %p618_p13 = pneg %p617_p12 }
  0x18   : > { %p624_p2 = por %p623_p1, %p622_p0 }
  0x1a   : > { %p625_p3 = pnand %p624_p2, %p618_p13 }
  0x1c   : > { %628 = shalt.err (!%p625_p3)
}
  0x1d   : > { %s714_s12 = smov 128   ;;  %s715_s18 = smov 8  }
  0x1e   : > { %545 = dma.hbm_to_vmem [thread:$0]  (!%p801_p9), %s169_s30, 1024, %s171_s5, %s159_s7, %s714_s12, %s714_s12, %s715_s18  }
  0x1f   : > { %p525_p4 = scmp.ge.s32.totalorder %s711_s17, 1  ;;  %p200_p5 = scmp.lt.s32.totalorder %s711_s17, 3 }
  0x20   : > { %s191_s28 = scalar_lea.hbm %s972_s1, %s534_s26  ;;  %s184_s29 = scalar_lea.vmem [#allocation4], %s519_s27 }
  0x21   : > { %p815_p6 = pnand %p525_p4, %p200_p5  ;;  %s192_s4 = sshll.u32 %s184_s29, 4  ;;  %s193_s4 = int_to_ptr.vmem [resolvable:$true] %s192_s4 }
  0x22   : > { %s181_s8 = scalar_lea.sflag [#allocation5], %s790_s25  ;;  %s642_s9 = scalar_lea.vmem %s193_s4, 1024 }
  0x23   : > { %p643_p8 = scmp.ne.s32.totalorder %s193_s4, %s642_s9  ;;  %s716_s30 = smov [#allocation4]  }
  0x24   : > { %s647_s5 = sshll.u32 %s716_s30, 4  ;;  %s648_s5 = int_to_ptr.vmem [resolvable:$false] %s647_s5 }
  0x25   : > { %p645_p11 = pnand %p643_p8, %p603_p10  ;;  %s649_s7 = scalar_lea.vmem %s648_s5, 2048 }
  0x26   : > { %p650_p13 = scmp.lt.s32.totalorder %s193_s4, %s648_s5  ;;  %p651_p0 = scmp.lt.s32.totalorder %s649_s7, %s642_s9 }
  0x27   : > { %p646_p12 = pneg %p645_p11 }
  0x28   : > { %p652_p1 = por %p651_p0, %p650_p13 }
  0x2a   : > { %p653_p2 = pnand %p652_p1, %p646_p12 }
  0x2c   : > { %656 = shalt.err (!%p653_p2)
}
  0x2d   : > { %548 = dma.hbm_to_vmem [thread:$0]  (!%p801_p9), %s191_s28, 1024, %s193_s4, %s181_s8, %s714_s12, %s714_s12, %s715_s18  }
  0x2e   : > { %204 = sbr.rel (%p815_p6) target bundleno = 77 (0x4d), region = 28  ;;  %s206_s25 = sand.u32 (!%p815_p6), 1, %s695_s13  }
  0x2f   : > { %s526_s26 = sshll.u32 (!%p815_p6), %s206_s25, 6  ;;  %s207_s27 = scalar_lea.sflag (!%p815_p6), [#allocation3], %s206_s25 }
  0x30   : > { %s833_s10 = scalar_lea.vmem (!%p815_p6), [#allocation2], %s526_s26 }
  0x33   : > { %682 = dma.done.wait (%p781_p7), %s207_s27, 1024  }
  0x34   : > { %684 = vsyncadd (%p781_p7), %s207_s27, 4294966272  ;;  %s216_s11 = scalar_lea.sflag [#allocation5], %s206_s25  ;;  %s839_s21 = scalar_lea.vmem [#allocation4], %s526_s26 }
  0x35   : > { %686 = dma.done.wait (%p781_p7), %s216_s11, 1024  }
  0x36   : > { %688 = vsyncadd (%p781_p7), %s216_s11, 4294966272  ;;  %p254_p9 = scmp.lt.s32.totalorder %s703_s15, 1  ;;  %vm268_vm0 = vcmask 130048   ;;  %v717_v0 = vmov 0.0   ;;  %v285_v1 = vld [vmem:[%s833_s10] sm:$0xff]  ;;  %v286_v3 = vld [vmem:[%s833_s10 + $0x8] sm:$0xff] }
  0x37   : > { %v293_v2 = vld [vmem:[%s839_s21] sm:$0xff]  ;;  %v294_v5 = vld [vmem:[%s839_s21 + $0x8] sm:$0xff]  ;;  %v287_v6 = vld [vmem:[%s833_s10 + $0x10] sm:$0xff] }
  0x38   : > { %s987_s15 = smov (!%p254_p9, %s703_s15), 1  ;;  %v301_v4 = vsub.f32 %v285_v1, %v293_v2  ;;  %v295_v7 = vld [vmem:[%s839_s21 + $0x10] sm:$0xff]  ;;  %v302_v8 = vsub.f32 %v286_v3, %v294_v5  ;;  %v288_v10 = vld [vmem:[%s833_s10 + $0x18] sm:$0xff]  ;;  %v289_v12 = vld [vmem:[%s833_s10 + $0x20] sm:$0xff] }
  0x39   : > { %s536_s6 = sshll.u32 %s987_s15, 6  ;;  %v303_v9 = vsub.f32 %v287_v6, %v295_v7  ;;  %v296_v11 = vld [vmem:[%s839_s21 + $0x18] sm:$0xff]  ;;  %v297_v14 = vld [vmem:[%s839_s21 + $0x20] sm:$0xff]  ;;  %v290_v15 = vld [vmem:[%s833_s10 + $0x28] sm:$0xff] }
  0x3a   : > { %s850_s20 = scalar_lea.vmem %s973_s2, %s536_s6  ;;  %s855_s23 = scalar_lea.vmem %s974_s3, %s536_s6  ;;  %v304_v13 = vsub.f32 %v288_v10, %v296_v11  ;;  %v298_v16 = vld [vmem:[%s839_s21 + $0x28] sm:$0xff]  ;;  %v305_v17 = vsub.f32 %v289_v12, %v297_v14  ;;  %v291_v19 = vld [vmem:[%s833_s10 + $0x30] sm:$0xff]  ;;  %v292_v21 = vld [vmem:[%s833_s10 + $0x38] sm:$0xff]  ;;  %v350_v24 = vmul.f32 %v301_v4, %v301_v4  ;;  %v351_v25 = vmul.f32 %v302_v8, %v302_v8 }
  0x3b   : > { %269 = vst.msk [vmem:[%s850_s20] sm:$0xff] %vm268_vm0, %v717_v0  ;;  %270 = vst.msk [vmem:[%s850_s20 + $0x8] sm:$0xff] %vm268_vm0, %v717_v0  ;;  %v306_v18 = vsub.f32 %v290_v15, %v298_v16  ;;  %v299_v20 = vld [vmem:[%s839_s21 + $0x30] sm:$0xff]  ;;  %v300_v23 = vld [vmem:[%s839_s21 + $0x38] sm:$0xff]  ;;  %v352_v26 = vmul.f32 %v303_v9, %v303_v9 }
  0x3c   : > { %271 = vst.msk [vmem:[%s850_s20 + $0x10] sm:$0xff] %vm268_vm0, %v717_v0  ;;  %272 = vst.msk [vmem:[%s850_s20 + $0x18] sm:$0xff] %vm268_vm0, %v717_v0  ;;  %v307_v22 = vsub.f32 %v291_v19, %v299_v20  ;;  %v308_v30 = vsub.f32 %v292_v21, %v300_v23  ;;  %v353_v31 = vmul.f32 %v304_v13, %v304_v13 }
  0x3d   : > { %273 = vst.msk [vmem:[%s850_s20 + $0x20] sm:$0xff] %vm268_vm0, %v717_v0  ;;  %274 = vst.msk [vmem:[%s850_s20 + $0x28] sm:$0xff] %vm268_vm0, %v717_v0  ;;  %v354_v32 = vmul.f32 %v305_v17, %v305_v17  ;;  %v355_v33 = vmul.f32 %v306_v18, %v306_v18 }
  0x3e   : > { %275 = vst.msk [vmem:[%s850_s20 + $0x30] sm:$0xff] %vm268_vm0, %v717_v0  ;;  %276 = vst.msk [vmem:[%s850_s20 + $0x38] sm:$0xff] %vm268_vm0, %v717_v0  ;;  %v356_v40 = vmul.f32 %v307_v22, %v307_v22  ;;  %v357_v47 = vmul.f32 %v308_v30, %v308_v30 }
  0x3f   : > { %277 = vst.msk [vmem:[%s855_s23] sm:$0xff] %vm268_vm0, %v717_v0  ;;  %278 = vst.msk [vmem:[%s855_s23 + $0x8] sm:$0xff] %vm268_vm0, %v717_v0 }
  0x40   : > { %279 = vst.msk [vmem:[%s855_s23 + $0x10] sm:$0xff] %vm268_vm0, %v717_v0  ;;  %280 = vst.msk [vmem:[%s855_s23 + $0x18] sm:$0xff] %vm268_vm0, %v717_v0 }
  0x41   : > { %281 = vst.msk [vmem:[%s855_s23 + $0x20] sm:$0xff] %vm268_vm0, %v717_v0  ;;  %282 = vst.msk [vmem:[%s855_s23 + $0x28] sm:$0xff] %vm268_vm0, %v717_v0 }
  0x42   : > { %283 = vst.msk [vmem:[%s855_s23 + $0x30] sm:$0xff] %vm268_vm0, %v717_v0  ;;  %284 = vst.msk [vmem:[%s855_s23 + $0x38] sm:$0xff] %vm268_vm0, %v717_v0  ;;  %v309_v27 = vld [vmem:[%s850_s20] sm:$0xff]  ;;  %v310_v28 = vld [vmem:[%s850_s20 + $0x8] sm:$0xff] }
  0x43   : > { %v311_v29 = vld [vmem:[%s850_s20 + $0x10] sm:$0xff]  ;;  %v325_v34 = vadd.f32 %v309_v27, %v301_v4  ;;  %v326_v35 = vadd.f32 %v310_v28, %v302_v8  ;;  %v312_v37 = vld [vmem:[%s850_s20 + $0x18] sm:$0xff] }
  0x44   : > { %v327_v36 = vadd.f32 %v311_v29, %v303_v9  ;;  %v313_v38 = vld [vmem:[%s850_s20 + $0x20] sm:$0xff]  ;;  %v314_v39 = vld [vmem:[%s850_s20 + $0x28] sm:$0xff]  ;;  %v328_v41 = vadd.f32 %v312_v37, %v304_v13 }
  0x45   : > { %v329_v42 = vadd.f32 %v313_v38, %v305_v17  ;;  %v330_v43 = vadd.f32 %v314_v39, %v306_v18  ;;  %v315_v44 = vld [vmem:[%s850_s20 + $0x30] sm:$0xff]  ;;  %v316_v45 = vld [vmem:[%s850_s20 + $0x38] sm:$0xff]  ;;  %334 = vst.msk [vmem:[%s850_s20] sm:$0xff] %vm268_vm0, %v325_v34  ;;  %335 = vst.msk [vmem:[%s850_s20 + $0x8] sm:$0xff] %vm268_vm0, %v326_v35 }
  0x46   : > { %v342_v46 = vld [vmem:[%s855_s23] sm:$0xff]  ;;  %336 = vst.msk [vmem:[%s850_s20 + $0x10] sm:$0xff] %vm268_vm0, %v327_v36  ;;  %v331_v48 = vadd.f32 %v315_v44, %v307_v22  ;;  %v332_v49 = vadd.f32 %v316_v45, %v308_v30  ;;  %v343_v51 = vld [vmem:[%s855_s23 + $0x8] sm:$0xff]  ;;  %337 = vst.msk [vmem:[%s850_s20 + $0x18] sm:$0xff] %vm268_vm0, %v328_v41 }
  0x47   : > { %v366_v50 = vadd.f32 %v350_v24, %v342_v46  ;;  %v344_v52 = vld [vmem:[%s855_s23 + $0x10] sm:$0xff]  ;;  %v345_v53 = vld [vmem:[%s855_s23 + $0x18] sm:$0xff]  ;;  %338 = vst.msk [vmem:[%s850_s20 + $0x20] sm:$0xff] %vm268_vm0, %v329_v42  ;;  %339 = vst.msk [vmem:[%s850_s20 + $0x28] sm:$0xff] %vm268_vm0, %v330_v43  ;;  %v367_v54 = vadd.f32 %v351_v25, %v343_v51 }
  0x48   : > { %v368_v55 = vadd.f32 %v352_v26, %v344_v52  ;;  %v369_v56 = vadd.f32 %v353_v31, %v345_v53  ;;  %v346_v57 = vld [vmem:[%s855_s23 + $0x20] sm:$0xff]  ;;  %v347_v58 = vld [vmem:[%s855_s23 + $0x28] sm:$0xff]  ;;  %340 = vst.msk [vmem:[%s850_s20 + $0x30] sm:$0xff] %vm268_vm0, %v331_v48  ;;  %341 = vst.msk [vmem:[%s850_s20 + $0x38] sm:$0xff] %vm268_vm0, %v332_v49 }
  0x49   : > { %v348_v59 = vld [vmem:[%s855_s23 + $0x30] sm:$0xff]  ;;  %374 = vst.msk [vmem:[%s855_s23] sm:$0xff] %vm268_vm0, %v366_v50  ;;  %v370_v60 = vadd.f32 %v354_v32, %v346_v57  ;;  %v371_v61 = vadd.f32 %v355_v33, %v347_v58  ;;  %v349_v63 = vld [vmem:[%s855_s23 + $0x38] sm:$0xff]  ;;  %375 = vst.msk [vmem:[%s855_s23 + $0x8] sm:$0xff] %vm268_vm0, %v367_v54 }
  0x4a   : > { %v372_v62 = vadd.f32 %v356_v40, %v348_v59  ;;  %376 = vst.msk [vmem:[%s855_s23 + $0x10] sm:$0xff] %vm268_vm0, %v368_v55  ;;  %377 = vst.msk [vmem:[%s855_s23 + $0x18] sm:$0xff] %vm268_vm0, %v369_v56  ;;  %v373_v0 = vadd.f32 %v357_v47, %v349_v63 }
  0x4b   : > { %378 = vst.msk [vmem:[%s855_s23 + $0x20] sm:$0xff] %vm268_vm0, %v370_v60  ;;  %379 = vst.msk [vmem:[%s855_s23 + $0x28] sm:$0xff] %vm268_vm0, %v371_v61 }
  0x4c   : > { %380 = vst.msk [vmem:[%s855_s23 + $0x30] sm:$0xff] %vm268_vm0, %v372_v62  ;;  %381 = vst.msk [vmem:[%s855_s23 + $0x38] sm:$0xff] %vm268_vm0, %v373_v0 }
  0x4d PF: > { %s20_s17 = sadd.s32 1, %s711_s17   ;;  %s979_s12 = smov %s695_s13 }
  0x4e   : > { %p17_p7 = scmp.ge.s32.totalorder %s20_s17, 4   ;;  %s980_s13 = smov %s699_s14 }
  0x4f   : > { %s981_s14 = smov %s787_s24  ;;  %s982_s15 = smov %s707_s16 }
  0x50   : > { %s983_s16 = smov %s985_s19  ;;  %19 = sbr.rel (!%p17_p7) target bundleno = 6 (0x6), region = 97 }
  0x55   :  { %419 = vsyncpa [#allocation3], 1 }
  0x56   :  { %421 = vsyncpa [#allocation3 + $0x1], 1 }
  0x57   :  { %422 = vsyncpa [#allocation5], 1 }
  0x58   :  { %424 = vsyncpa [#allocation5 + $0x1], 1 }

// kernel: loss_rmse_fdl.3
= control target key start
LH: loop header
LB: loop body
LE: loop exit
PB: predicated region body
PF: predicated region fallthrough
CT: control target
= control target key end

     0   :  { %vm40_vm0 = vcmask 130048   ;;  %s2423_s0 = inlined_call_operand.vmem [shape: f32[2,64,16], index: 0, kind: input, shape index: {}]   ;;  %s2424_s1 = inlined_call_operand.vmem [shape: f32[2,64,16], index: 1, kind: input, shape index: {}]   ;;  %s2425_s2 = inlined_call_operand.vmem [shape: f32[16,16], index: 2, kind: input, shape index: {}, may-alias: {2,4}]   ;;  %s2426_s3 = inlined_call_operand.vmem [shape: f32[16,16], index: 3, kind: input, shape index: {}, may-alias: {3,5}]   ;;  %s2427_s4 = inlined_call_operand.vmem [shape: f32[16,16], index: 4, kind: input, shape index: {}, may-alias: {2,4}]   ;;  %s2428_s5 = inlined_call_operand.vmem [shape: f32[16,16], index: 5, kind: input, shape index: {}, may-alias: {3,5}]   ;;  %s2429_s6 = inlined_call_operand.hbm [shape: f32[1,1], index: 6, kind: output, shape index: {}]  }
   0x1   :  { %v139_v0 = vld [vmem:[%s2425_s2 + $0x8] sm:$0xff]  ;;  %v138_v2 = vld [vmem:[%s2425_s2] sm:$0xff]  ;;  %v26_v10 = vld [vmem:[%s2423_s0 + $0x10] sm:$0xff] }
   0x2   :  { %v141_v1 = vld [vmem:[%s2426_s3 + $0x8] sm:$0xff]  ;;  %1904 = vmatprep.subr.mxu0 %v139_v0  ;;  %v140_v3 = vld [vmem:[%s2426_s3] sm:$0xff]  ;;  %v34_v14 = vld [vmem:[%s2423_s0 + $0x50] sm:$0xff]  ;;  %v47_v15 = vsel %vm40_vm0, %v26_v10, 0.0 }
   0x3   :  { %1920 = vmatprep.subr.mxu1 %v141_v1  ;;  %v24_v4 = vld [vmem:[%s2423_s0] sm:$0xff]  ;;  %1905 = vmatpush3.msra.mxu0 %v139_v0  ;;  %v25_v8 = vld [vmem:[%s2423_s0 + $0x8] sm:$0xff]  ;;  %v27_v16 = vld [vmem:[%s2423_s0 + $0x18] sm:$0xff]  ;;  %v48_v19 = vsel %vm40_vm0, %v34_v14, 0.0 }
   0x4   :  { %v32_v5 = vld [vmem:[%s2423_s0 + $0x40] sm:$0xff]  ;;  %1921 = vmatpush3.msra.mxu1 %v141_v1  ;;  %v41_v6 = vsel %vm40_vm0, %v24_v4, 0.0  ;;  %v33_v9 = vld [vmem:[%s2423_s0 + $0x48] sm:$0xff]  ;;  %1906 = vmatprep.subr.mxu0 %v138_v2  ;;  %v44_v12 = vsel %vm40_vm0, %v25_v8, 0.0  ;;  %v35_v17 = vld [vmem:[%s2423_s0 + $0x58] sm:$0xff]  ;;  %v50_v20 = vsel %vm40_vm0, %v27_v16, 0.0  ;;  %v49_v25 = vadd.f32 %v48_v19, %v47_v15 }
   0x5   :  { %v42_v7 = vsel %vm40_vm0, %v32_v5, 0.0  ;;  %1922 = vmatprep.subr.mxu1 %v140_v3  ;;  %v45_v13 = vsel %vm40_vm0, %v33_v9, 0.0  ;;  %1907 = vmatpush3.msra.mxu0 %v138_v2  ;;  %v51_v21 = vsel %vm40_vm0, %v35_v17, 0.0  ;;  %v28_v22 = vld [vmem:[%s2423_s0 + $0x20] sm:$0xff]  ;;  %v29_v24 = vld [vmem:[%s2423_s0 + $0x28] sm:$0xff]  ;;  %v30_v29 = vld [vmem:[%s2423_s0 + $0x30] sm:$0xff] }
   0x6   :  { %v43_v11 = vadd.f32 %v42_v7, %v41_v6  ;;  %1923 = vmatpush3.msra.mxu1 %v140_v3  ;;  %v46_v18 = vadd.f32 %v45_v13, %v44_v12  ;;  %v36_v23 = vld [vmem:[%s2423_s0 + $0x60] sm:$0xff]  ;;  %v53_v26 = vsel %vm40_vm0, %v28_v22, 0.0  ;;  %v37_v28 = vld [vmem:[%s2423_s0 + $0x68] sm:$0xff]  ;;  %v38_v30 = vld [vmem:[%s2423_s0 + $0x70] sm:$0xff]  ;;  %v52_v31 = vadd.f32 %v51_v21, %v50_v20 }
   0x7   :  { %v54_v27 = vsel %vm40_vm0, %v36_v23, 0.0  ;;  %v56_v33 = vsel %vm40_vm0, %v29_v24, 0.0  ;;  %v57_v34 = vsel %vm40_vm0, %v37_v28, 0.0 }
   0x8   :  { %1908 = vmatprep.mubr.msk.f32.mxu0 %vm40_vm0, %v43_v11  ;;  %1924 = vmatprep.mubr.msk.f32.mxu1 %vm40_vm0, %v43_v11  ;;  %v55_v32 = vadd.f32 %v54_v27, %v53_v26 }
   0x9   :  { %1909 = vmatmul.mubr.msk.f32.vlgmr.msra.gmra.mxu0 %vm40_vm0, %v46_v18  ;;  %1925 = vmatmul.mubr.msk.f32.vlgmr.msra.gmra.mxu1 %vm40_vm0, %v46_v18 }
   0xa   :  { %1927 = vmatprep.mubr.msk.f32.mxu1 %vm40_vm0, %v49_v25  ;;  %1911 = vmatprep.mubr.msk.f32.mxu0 %vm40_vm0, %v49_v25 }
   0xb   :  { %11 = vsyncpa [#allocation3], 0  ;;  %v59_v35 = vsel %vm40_vm0, %v30_v29, 0.0  ;;  %v60_v36 = vsel %vm40_vm0, %v38_v30, 0.0  ;;  %v31_v37 = vld [vmem:[%s2423_s0 + $0x38] sm:$0xff]  ;;  %v58_v39 = vadd.f32 %v57_v34, %v56_v33  ;;  %v2228_v44 = vld [vmem:[%s2427_s4] sm:$0xff] }
   0xc   :  { %v39_v38 = vld [vmem:[%s2423_s0 + $0x78] sm:$0xff]  ;;  %v61_v40 = vadd.f32 %v60_v36, %v59_v35  ;;  %v62_v41 = vsel %vm40_vm0, %v31_v37, 0.0  ;;  %v2235_v45 = vld [vmem:[%s2428_s5] sm:$0xff]  ;;  %v2242_v52 = vld [vmem:[%s2427_s4 + $0x8] sm:$0xff]  ;;  %s2097_s21 = smov [#allocation2]   ;;  %vm1756_vm11 = vcmask 0  }
   0xd   :  { %1928 = vmatmul.mubr.msk.f32.gmra.mxu1 %vm40_vm0, %v52_v31  ;;  %1912 = vmatmul.mubr.msk.f32.gmra.mxu0 %vm40_vm0, %v52_v31  ;;  %v63_v42 = vsel %vm40_vm0, %v39_v38, 0.0  ;;  %v2247_v53 = vld [vmem:[%s2428_s5 + $0x8] sm:$0xff]  ;;  %v65_v8 = vld [vmem:[%s2424_s1] sm:$0xff]  ;;  %v67_v15 = vld [vmem:[%s2424_s1 + $0x10] sm:$0xff]  ;;  %s1764_s22 = sshll.u32 %s2097_s21, 4  ;;  %s1765_s22 = int_to_ptr.vmem [resolvable:$true] %s1764_s22 }
   0xe   :  { %1930 = vmatprep.mubr.msk.f32.mxu1 %vm40_vm0, %v55_v32  ;;  %1914 = vmatprep.mubr.msk.f32.mxu0 %vm40_vm0, %v55_v32  ;;  %v64_v43 = vadd.f32 %v63_v42, %v62_v41  ;;  %v66_v9 = vld [vmem:[%s2424_s1 + $0x8] sm:$0xff]  ;;  %v73_v10 = vld [vmem:[%s2424_s1 + $0x40] sm:$0xff]  ;;  %v81_v12 = vsel %vm40_vm0, %v65_v8, 0.0  ;;  %v75_v16 = vld [vmem:[%s2424_s1 + $0x50] sm:$0xff]  ;;  %v87_v20 = vsel %vm40_vm0, %v67_v15, 0.0  ;;  %s2075_s23 = scalar_lea.vmem %s1765_s22, 16  ;;  %p2080_p1 = scmp.lt.s32.totalorder %s1765_s22, %s1765_s22 }
   0xf   :  { %v74_v11 = vld [vmem:[%s2424_s1 + $0x48] sm:$0xff]  ;;  %v82_v13 = vsel %vm40_vm0, %v73_v10, 0.0  ;;  %v84_v14 = vsel %vm40_vm0, %v66_v9, 0.0  ;;  %v88_v21 = vsel %vm40_vm0, %v75_v16, 0.0  ;;  %v68_v22 = vld [vmem:[%s2424_s1 + $0x18] sm:$0xff]  ;;  %v69_v29 = vld [vmem:[%s2424_s1 + $0x20] sm:$0xff]  ;;  %p2076_p0 = scmp.ne.s32.totalorder %s1765_s22, %s2075_s23 }
  0x10   :  { %v83_v17 = vadd.f32 %v82_v13, %v81_v12  ;;  %v85_v18 = vsel %vm40_vm0, %v74_v11, 0.0  ;;  %v76_v23 = vld [vmem:[%s2424_s1 + $0x58] sm:$0xff]  ;;  %v89_v24 = vadd.f32 %v88_v21, %v87_v20  ;;  %v90_v26 = vsel %vm40_vm0, %v68_v22, 0.0  ;;  %v77_v30 = vld [vmem:[%s2424_s1 + $0x60] sm:$0xff]  ;;  %v70_v36 = vld [vmem:[%s2424_s1 + $0x28] sm:$0xff]  ;;  %s2079_s24 = scalar_lea.vmem %s1765_s22, 32 }
  0x11   :  { %1931 = vmatmul.mubr.msk.f32.gmra.mxu1 %vm40_vm0, %v58_v39  ;;  %1915 = vmatmul.mubr.msk.f32.gmra.mxu0 %vm40_vm0, %v58_v39  ;;  %v86_v19 = vadd.f32 %v85_v18, %v84_v14  ;;  %v91_v27 = vsel %vm40_vm0, %v76_v23, 0.0  ;;  %v93_v34 = vsel %vm40_vm0, %v69_v29, 0.0  ;;  %v94_v35 = vsel %vm40_vm0, %v77_v30, 0.0  ;;  %v78_v37 = vld [vmem:[%s2424_s1 + $0x68] sm:$0xff]  ;;  %p2081_p2 = scmp.lt.s32.totalorder %s2079_s24, %s2075_s23 }
  0x12   :  { %1933 = vmatprep.mubr.msk.f32.mxu1 %vm40_vm0, %v61_v40  ;;  %1917 = vmatprep.mubr.msk.f32.mxu0 %vm40_vm0, %v61_v40  ;;  %v105_v25 = vsel %vm40_vm0, %v83_v17, 0.0  ;;  %v92_v31 = vadd.f32 %v91_v27, %v90_v26  ;;  %v108_v33 = vsel %vm40_vm0, %v89_v24, 0.0  ;;  %v95_v38 = vadd.f32 %v94_v35, %v93_v34 }
  0x13   :  { %v106_v28 = vsel %vm40_vm0, %v86_v19, 0.0  ;;  %v96_v41 = vsel %vm40_vm0, %v70_v36, 0.0  ;;  %v97_v42 = vsel %vm40_vm0, %v78_v37, 0.0  ;;  %p2082_p3 = por %p2081_p2, %p2080_p1 }
  0x14   :  { %v107_v32 = vadd.f32 %v106_v28, %v105_v25  ;;  %v110_v40 = vsel %vm40_vm0, %v92_v31, 0.0 }
  0x15   :  { %1934 = vmatmul.mubr.msk.f32.gmra.mxu1 %vm40_vm0, %v64_v43  ;;  %1918 = vmatmul.mubr.msk.f32.gmra.mxu0 %vm40_vm0, %v64_v43  ;;  %v71_v43 = vld [vmem:[%s2424_s1 + $0x30] sm:$0xff]  ;;  %p2083_p4 = pnand %p2082_p3, %p2076_p0 }
  0x16   :  { %1947 = vmatprep.mubr.msk.f32.mxu1 %vm40_vm0, %v2228_v44  ;;  %1940 = vmatprep.mubr.msk.f32.mxu0 %vm40_vm0, %v2235_v45  ;;  %v109_v39 = vadd.f32 %v108_v33, %v107_v32 }
  0xc9   :  { %v1910_v46 = vpop.f32.mrf.mxu0  ;;  %v1926_v47 = vpop.f32.mrf.mxu1 }
  0xca   :  { %v377_v48 = vsub.f32 0.0, %v1926_v47  ;;  %1943 = vmatprep.subr.mxu1 %v1910_v46  ;;  %v112_v47 = vsel %vm40_vm0, %v95_v38, 0.0 }
  0xcb   :  { %v232_v49 = vpop.f32.mrf.mxu0  ;;  %v337_v50 = vpop.f32.mrf.mxu1  ;;  %1944 = vmatpush3.msra.mxu1 %v1910_v46 }
  0xcc   :  { %v376_v51 = vsub.f32 0.0, %v337_v50  ;;  %1936 = vmatprep.subr.mxu0 %v377_v48  ;;  %1945 = vmatprep.subr.mxu1 %v232_v49  ;;  %v72_v50 = vld [vmem:[%s2424_s1 + $0x38] sm:$0xff] }
  0xcd   :  { %1937 = vmatpush3.msra.mxu0 %v377_v48  ;;  %1946 = vmatpush3.msra.mxu1 %v232_v49  ;;  %v1929_v54 = vpop.f32.mrf.mxu1  ;;  %v1913_v55 = vpop.f32.mrf.mxu0 }
  0xce   :  { %1938 = vmatprep.subr.mxu0 %v376_v51  ;;  %1957 = vmatprep.subr.mxu1 %v1910_v46  ;;  %v379_v56 = vsub.f32 0.0, %v1929_v54 }
  0xcf   :  { %1939 = vmatpush3.msra.mxu0 %v376_v51  ;;  %1948 = vmatmul.mubr.msk.f32.vlgmr.msra.gmra.mxu1 %vm40_vm0, %v2242_v52  ;;  %v347_v57 = vpop.f32.mrf.mxu1  ;;  %v242_v58 = vpop.f32.mrf.mxu0 }
  0xd0   :  { %1958 = vmatpush3.msra.mxu1 %v1910_v46  ;;  %1941 = vmatmul.mubr.msk.f32.vlgmr.msra.gmra.mxu0 %vm40_vm0, %v2247_v53  ;;  %v378_v59 = vsub.f32 0.0, %v347_v57  ;;  %v111_v46 = vadd.f32 %v110_v40, %v109_v39 }
  0xd1   :  { %1950 = vmatprep.subr.mxu0 %v377_v48  ;;  %1959 = vmatprep.subr.mxu1 %v232_v49  ;;  %v1932_v60 = vpop.f32.mrf.mxu1  ;;  %v1916_v61 = vpop.f32.mrf.mxu0 }
  0xd2   :  { %1951 = vmatpush3.msra.mxu0 %v377_v48  ;;  %1960 = vmatpush3.msra.mxu1 %v232_v49  ;;  %v381_v62 = vsub.f32 0.0, %v1932_v60  ;;  %v99_v48 = vsel %vm40_vm0, %v71_v43, 0.0 }
  0xd3   :  { %1952 = vmatprep.subr.mxu0 %v376_v51  ;;  %1954 = vmatprep.mubr.msk.f32.mxu0 %vm40_vm0, %v2228_v44  ;;  %v357_v63 = vpop.f32.mrf.mxu1  ;;  %v252_v0 = vpop.f32.mrf.mxu0 }
  0xd4   :  { %1953 = vmatpush3.msra.mxu0 %v376_v51  ;;  %1961 = vmatprep.mubr.msk.f32.mxu1 %vm40_vm0, %v2235_v45  ;;  %v380_v1 = vsub.f32 0.0, %v357_v63  ;;  %v80_v51 = vld [vmem:[%s2424_s1 + $0x78] sm:$0xff] }
  0xd5   :  { %1955 = vmatmul.mubr.msk.f32.vlgmr.msra.gmra.mxu0 %vm40_vm0, %v2242_v52  ;;  %1962 = vmatmul.mubr.msk.f32.vlgmr.msra.gmra.mxu1 %vm40_vm0, %v2247_v53  ;;  %v1935_v2 = vpop.f32.mrf.mxu1  ;;  %v1919_v3 = vpop.f32.mrf.mxu0 }
  0xd6   :  { %1964 = vmatprep.subr.mxu0 %v379_v56  ;;  %1971 = vmatprep.subr.mxu1 %v1913_v55  ;;  %v383_v4 = vsub.f32 0.0, %v1935_v2 }
  0xd7   :  { %1965 = vmatpush3.msra.mxu0 %v379_v56  ;;  %1972 = vmatpush3.msra.mxu1 %v1913_v55  ;;  %v367_v5 = vpop.f32.mrf.mxu1  ;;  %v262_v6 = vpop.f32.mrf.mxu0 }
  0xd8   :  { %1966 = vmatprep.subr.mxu0 %v378_v59  ;;  %1973 = vmatprep.subr.mxu1 %v242_v58  ;;  %v382_v7 = vsub.f32 0.0, %v367_v5 }
  0xd9   :  { %1967 = vmatpush3.msra.mxu0 %v378_v59  ;;  %1968 = vmatprep.mubr.msk.f32.mxu0 %vm40_vm0, %v2235_v45 }
  0xda   :  { %1974 = vmatpush3.msra.mxu1 %v242_v58  ;;  %1975 = vmatprep.mubr.msk.f32.mxu1 %vm40_vm0, %v2228_v44 }
  0xdb   :  { %1969 = vmatmul.mubr.msk.f32.vlgmr.msra.gmra.mxu0 %vm40_vm0, %v2247_v53  ;;  %1976 = vmatmul.mubr.msk.f32.vlgmr.msra.gmra.mxu1 %vm40_vm0, %v2242_v52 }
  0xdc   :  { %1978 = vmatprep.subr.mxu0 %v379_v56  ;;  %1985 = vmatprep.subr.mxu1 %v1913_v55 }
  0xdd   :  { %1979 = vmatpush3.msra.mxu0 %v379_v56  ;;  %1986 = vmatpush3.msra.mxu1 %v1913_v55  ;;  %v102_v55 = vsel %vm40_vm0, %v72_v50, 0.0  ;;  %v103_v56 = vsel %vm40_vm0, %v80_v51, 0.0 }
  0xde   :  { %1980 = vmatprep.subr.mxu0 %v378_v59  ;;  %1987 = vmatprep.subr.mxu1 %v242_v58  ;;  %v104_v57 = vadd.f32 %v103_v56, %v102_v55 }
  0xdf   :  { %1981 = vmatpush3.msra.mxu0 %v378_v59  ;;  %1982 = vmatprep.mubr.msk.f32.mxu0 %vm40_vm0, %v2228_v44 }
  0xe0   :  { %1988 = vmatpush3.msra.mxu1 %v242_v58  ;;  %1989 = vmatprep.mubr.msk.f32.mxu1 %vm40_vm0, %v2235_v45 }
  0xe1   :  { %1983 = vmatmul.mubr.msk.f32.vlgmr.msra.gmra.mxu0 %vm40_vm0, %v2242_v52  ;;  %1990 = vmatmul.mubr.msk.f32.vlgmr.msra.gmra.mxu1 %vm40_vm0, %v2247_v53 }
  0xe2   :  { %1992 = vmatprep.subr.mxu0 %v381_v62  ;;  %1999 = vmatprep.subr.mxu1 %v1916_v61 }
  0xe3   :  { %1993 = vmatpush3.msra.mxu0 %v381_v62  ;;  %2000 = vmatpush3.msra.mxu1 %v1916_v61 }
  0xe4   :  { %1994 = vmatprep.subr.mxu0 %v380_v1  ;;  %2001 = vmatprep.subr.mxu1 %v252_v0 }
  0xe5   :  { %1995 = vmatpush3.msra.mxu0 %v380_v1  ;;  %1996 = vmatprep.mubr.msk.f32.mxu0 %vm40_vm0, %v2235_v45 }
  0xe6   :  { %2002 = vmatpush3.msra.mxu1 %v252_v0  ;;  %2003 = vmatprep.mubr.msk.f32.mxu1 %vm40_vm0, %v2228_v44 }
  0xe7   :  { %1997 = vmatmul.mubr.msk.f32.vlgmr.msra.gmra.mxu0 %vm40_vm0, %v2247_v53  ;;  %2004 = vmatmul.mubr.msk.f32.vlgmr.msra.gmra.mxu1 %vm40_vm0, %v2242_v52 }
  0xe8   :  { %2006 = vmatprep.subr.mxu0 %v381_v62  ;;  %2013 = vmatprep.subr.mxu1 %v1916_v61 }
  0xe9   :  { %2007 = vmatpush3.msra.mxu0 %v381_v62  ;;  %2014 = vmatpush3.msra.mxu1 %v1916_v61  ;;  %v118_v61 = vsel %vm40_vm0, %v104_v57, 0.0 }
  0xea   :  { %2008 = vmatprep.subr.mxu0 %v380_v1  ;;  %2015 = vmatprep.subr.mxu1 %v252_v0 }
  0xeb   :  { %2009 = vmatpush3.msra.mxu0 %v380_v1  ;;  %2010 = vmatprep.mubr.msk.f32.mxu0 %vm40_vm0, %v2228_v44 }
  0xec   :  { %2016 = vmatpush3.msra.mxu1 %v252_v0  ;;  %2017 = vmatprep.mubr.msk.f32.mxu1 %vm40_vm0, %v2235_v45 }
  0xed   :  { %2011 = vmatmul.mubr.msk.f32.vlgmr.msra.gmra.mxu0 %vm40_vm0, %v2242_v52  ;;  %2018 = vmatmul.mubr.msk.f32.vlgmr.msra.gmra.mxu1 %vm40_vm0, %v2247_v53 }
  0xee   :  { %2020 = vmatprep.subr.mxu0 %v383_v4  ;;  %2027 = vmatprep.subr.mxu1 %v1919_v3 }
  0xef   :  { %2021 = vmatpush3.msra.mxu0 %v383_v4  ;;  %2028 = vmatpush3.msra.mxu1 %v1919_v3 }
  0xf0   :  { %2022 = vmatprep.subr.mxu0 %v382_v7  ;;  %2029 = vmatprep.subr.mxu1 %v262_v6 }
  0xf1   :  { %2023 = vmatpush3.msra.mxu0 %v382_v7  ;;  %2024 = vmatprep.mubr.msk.f32.mxu0 %vm40_vm0, %v2235_v45 }
  0xf2   :  { %2030 = vmatpush3.msra.mxu1 %v262_v6  ;;  %2031 = vmatprep.mubr.msk.f32.mxu1 %vm40_vm0, %v2228_v44 }
  0xf3   :  { %2025 = vmatmul.mubr.msk.f32.vlgmr.msra.gmra.mxu0 %vm40_vm0, %v2247_v53  ;;  %2032 = vmatmul.mubr.msk.f32.vlgmr.msra.gmra.mxu1 %vm40_vm0, %v2242_v52 }
  0xf4   :  { %2034 = vmatprep.subr.mxu0 %v383_v4  ;;  %2041 = vmatprep.subr.mxu1 %v1919_v3 }
  0xf5   :  { %2035 = vmatpush3.msra.mxu0 %v383_v4  ;;  %2042 = vmatpush3.msra.mxu1 %v1919_v3 }
  0xf6   :  { %2036 = vmatprep.subr.mxu0 %v382_v7  ;;  %2043 = vmatprep.subr.mxu1 %v262_v6 }
  0xf7   :  { %2037 = vmatpush3.msra.mxu0 %v382_v7  ;;  %2038 = vmatprep.mubr.msk.f32.mxu0 %vm40_vm0, %v2228_v44  ;;  %v79_v44 = vld [vmem:[%s2424_s1 + $0x70] sm:$0xff] }
  0xf8   :  { %2044 = vmatpush3.msra.mxu1 %v262_v6  ;;  %2045 = vmatprep.mubr.msk.f32.mxu1 %vm40_vm0, %v2235_v45  ;;  %v98_v45 = vadd.f32 %v97_v42, %v96_v41  ;;  %v100_v49 = vsel %vm40_vm0, %v79_v44, 0.0 }
  0xf9   :  { %2039 = vmatmul.mubr.msk.f32.vlgmr.msra.gmra.mxu0 %vm40_vm0, %v2242_v52  ;;  %2046 = vmatmul.mubr.msk.f32.vlgmr.msra.gmra.mxu1 %vm40_vm0, %v2247_v53  ;;  %v101_v52 = vadd.f32 %v100_v49, %v99_v48  ;;  %v113_v53 = vadd.f32 %v112_v47, %v111_v46 }
  0xfa   :  { %v114_v54 = vsel %vm40_vm0, %v98_v45, 0.0 }
  0xfb   :  { %v115_v58 = vadd.f32 %v114_v54, %v113_v53  ;;  %v116_v59 = vsel %vm40_vm0, %v101_v52, 0.0 }
  0xfd   :  { %v117_v60 = vadd.f32 %v116_v59, %v115_v58 }
  0xff   :  { %v119_v62 = vadd.f32 %v118_v61, %v117_v60 }
 0x101   :  { %120 = vadd.xlane.f32.xlu0 %v119_v62 }
 0x18f   :  { %v1949_v63 = vpop.f32.mrf.mxu1 }
 0x190   :  { %v1942_v0 = vpop.f32.mrf.mxu0 }
 0x191   :  { %v541_v1 = vpop.f32.mrf.mxu1  ;;  %v547_v19 = vadd.f32 %v1949_v63, %v1942_v0 }
 0x192   :  { %v460_v2 = vpop.f32.mrf.mxu0 }
 0x193   :  { %v703_v28 = vmul.f32 %v547_v19, %v547_v19  ;;  %v542_v30 = vadd.f32 %v541_v1, %v460_v2 }
 0x195   :  { %v1956_v3 = vpop.f32.mrf.mxu0  ;;  %v1963_v4 = vpop.f32.mrf.mxu1  ;;  %v702_v46 = vmul.f32 %v542_v30, %v542_v30 }
 0x196   :  { %v701_v15 = vsub.f32 %v1956_v3, %v1963_v4 }
 0x197   :  { %v616_v5 = vpop.f32.mrf.mxu0  ;;  %v691_v6 = vpop.f32.mrf.mxu1 }
 0x198   :  { %v705_v24 = vmul.f32 %v701_v15, %v701_v15  ;;  %v700_v25 = vsub.f32 %v616_v5, %v691_v6 }
 0x19a   :  { %v707_v35 = vadd.f32 %v705_v24, %v703_v28  ;;  %v704_v38 = vmul.f32 %v700_v25, %v700_v25 }
 0x19b   :  { %v1970_v7 = vpop.f32.mrf.mxu0  ;;  %v1977_v8 = vpop.f32.mrf.mxu1 }
 0x19c   :  { %v857_v20 = vadd.f32 %v1977_v8, %v1970_v7  ;;  %v2381_v48 = vmul.f32 0.25, %v707_v35  ;;  %v706_v52 = vadd.f32 %v704_v38, %v702_v46 }
 0x19d   :  { %v776_v9 = vpop.f32.mrf.mxu0  ;;  %v851_v10 = vpop.f32.mrf.mxu1 }
 0x19e   :  { %v852_v26 = vadd.f32 %v851_v10, %v776_v9  ;;  %v1013_v31 = vmul.f32 %v857_v20, %v857_v20  ;;  %v1641_v60 = vadd.f32 1.0, %v2381_v48  ;;  %v2390_v62 = vmul.f32 0.25, %v706_v52 }
 0x1a0   :  { %v1012_v39 = vmul.f32 %v852_v26, %v852_v26  ;;  %2055 = vlog2.f32 %v1641_v60  ;;  %v1640_v8 = vadd.f32 1.0, %v2390_v62 }
 0x1a1   :  { %v1984_v11 = vpop.f32.mrf.mxu0  ;;  %v1991_v12 = vpop.f32.mrf.mxu1 }
 0x1a2   :  { %v1011_v16 = vsub.f32 %v1984_v11, %v1991_v12 }
 0x1a3   :  { %v926_v13 = vpop.f32.mrf.mxu0  ;;  %v1001_v14 = vpop.f32.mrf.mxu1 }
 0x1a4   :  { %v1010_v21 = vsub.f32 %v926_v13, %v1001_v14  ;;  %v1015_v27 = vmul.f32 %v1011_v16, %v1011_v16 }
 0x1a6   :  { %v1014_v32 = vmul.f32 %v1010_v21, %v1010_v21  ;;  %v1017_v40 = vadd.f32 %v1015_v27, %v1013_v31  ;;  %v121_v31 = vpop.xlane.xlu0 %120 }
 0x1a7   :  { %v1998_v17 = vpop.f32.mrf.mxu0  ;;  %v2005_v18 = vpop.f32.mrf.mxu1 }
 0x1a8   :  { %v1167_v29 = vadd.f32 %v2005_v18, %v1998_v17  ;;  %v1016_v47 = vadd.f32 %v1014_v32, %v1012_v39  ;;  %v2383_v53 = vmul.f32 0.25, %v1017_v40 }
 0x1a9   :  { %v1086_v22 = vpop.f32.mrf.mxu0  ;;  %v1161_v23 = vpop.f32.mrf.mxu1 }
 0x1aa   :  { %v1162_v36 = vadd.f32 %v1161_v23, %v1086_v22  ;;  %v1323_v43 = vmul.f32 %v1167_v29, %v1167_v29  ;;  %v2385_v57 = vmul.f32 0.25, %v1016_v47  ;;  %v1647_v63 = vadd.f32 1.0, %v2383_v53 }
 0x1ac   :  { %v1322_v49 = vmul.f32 %v1162_v36, %v1162_v36  ;;  %v1646_v2 = vadd.f32 1.0, %v2385_v57  ;;  %2057 = vlog2.f32 %v1647_v63 }
 0x1ad   :  { %v2012_v33 = vpop.f32.mrf.mxu0  ;;  %v2019_v34 = vpop.f32.mrf.mxu1 }
 0x1ae   :  { %v1321_v37 = vsub.f32 %v2012_v33, %v2019_v34  ;;  %2059 = vlog2.f32 %v1646_v2  ;;  %v2056_v23 = vpop.eup %2055  ;;  %v122_v34 = vrot.slane %v121_v31, 4 }
 0x1af   :  { %v1236_v41 = vpop.f32.mrf.mxu0  ;;  %v1311_v42 = vpop.f32.mrf.mxu1  ;;  %v1645_v30 = vmul.f32 0.6931472, %v2056_v23 }
 0x1b0   :  { %v1325_v44 = vmul.f32 %v1321_v37, %v1321_v37  ;;  %v1320_v45 = vsub.f32 %v1236_v41, %v1311_v42  ;;  %v123_v38 = vadd.f32 %v122_v34, %v121_v31 }
 0x1b2   :  { %v1327_v50 = vadd.f32 %v1325_v44, %v1323_v43  ;;  %v1324_v51 = vmul.f32 %v1320_v45, %v1320_v45  ;;  %v124_v43 = vrot.slane %v123_v38, 2 }
 0x1b3   :  { %v2026_v54 = vpop.f32.mrf.mxu0  ;;  %v2033_v55 = vpop.f32.mrf.mxu1 }
 0x1b4   :  { %v1326_v56 = vadd.f32 %v1324_v51, %v1322_v49  ;;  %v2388_v61 = vmul.f32 0.25, %v1327_v50  ;;  %v1477_v1 = vadd.f32 %v2033_v55, %v2026_v54  ;;  %v125_v49 = vadd.f32 %v124_v43, %v123_v38 }
 0x1b5   :  { %v1396_v58 = vpop.f32.mrf.mxu0  ;;  %v1471_v59 = vpop.f32.mrf.mxu1 }
 0x1b6   :  { %v2393_v0 = vmul.f32 0.25, %v1326_v56  ;;  %v1653_v5 = vadd.f32 1.0, %v2388_v61  ;;  %v1472_v6 = vadd.f32 %v1471_v59, %v1396_v58  ;;  %v1633_v12 = vmul.f32 %v1477_v1, %v1477_v1 }
 0x1b7   :  { %v126_v51 = vrot.slane %v125_v49, 1 }
 0x1b8   :  { %v1652_v11 = vadd.f32 1.0, %v2393_v0  ;;  %2061 = vlog2.f32 %v1653_v5  ;;  %v1632_v15 = vmul.f32 %v1472_v6, %v1472_v6 }
 0x1b9   :  { %v2040_v3 = vpop.f32.mrf.mxu0  ;;  %v2047_v4 = vpop.f32.mrf.mxu1  ;;  %2063 = vlog2.f32 %v1640_v8  ;;  %v127_v55 = vadd.f32 %v126_v51, %v125_v49 }
 0x1ba   :  { %v1631_v7 = vsub.f32 %v2040_v3, %v2047_v4  ;;  %2065 = vlog2.f32 %v1652_v11  ;;  %v2058_v24 = vpop.eup %2057 }
 0x1bb   :  { %v1546_v9 = vpop.f32.mrf.mxu0  ;;  %v1621_v10 = vpop.f32.mrf.mxu1  ;;  %v1651_v28 = vmul.f32 0.6931472, %v2058_v24  ;;  %2048 = vpush %v127_v55 }
 0x1bc   :  { %v1635_v13 = vmul.f32 %v1631_v7, %v1631_v7  ;;  %v1630_v14 = vsub.f32 %v1546_v9, %v1621_v10  ;;  %v2060_v25 = vpop.eup %2059 }
 0x1bd   :  { %v1649_v32 = vmul.f32 0.6931472, %v2060_v25  ;;  %v1665_v37 = vmax.f32 %v1645_v30, %v1651_v28 }
 0x1be   :  { %v1637_v16 = vadd.f32 %v1635_v13, %v1633_v12  ;;  %v1634_v17 = vmul.f32 %v1630_v14, %v1630_v14 }
 0x1c0   :  { %v2399_v18 = vmul.f32 0.25, %v1637_v16  ;;  %v1636_v19 = vadd.f32 %v1634_v17, %v1632_v15 }
 0x1c2   :  { %v1659_v20 = vadd.f32 1.0, %v2399_v18  ;;  %v2402_v21 = vmul.f32 0.25, %v1636_v19 }
 0x1c4   :  { %2067 = vlog2.f32 %v1659_v20  ;;  %v1658_v22 = vadd.f32 1.0, %v2402_v21 }
 0x1c5   :  { %v2062_v26 = vpop.eup %2061 }
 0x1c6   :  { %2069 = vlog2.f32 %v1658_v22  ;;  %v2064_v27 = vpop.eup %2063  ;;  %v1657_v33 = vmul.f32 0.6931472, %v2062_v26 }
 0x1c7   :  { %v2066_v29 = vpop.eup %2065  ;;  %v1643_v35 = vmul.f32 0.6931472, %v2064_v27 }
 0x1c8   :  { %v1655_v36 = vmul.f32 0.6931472, %v2066_v29  ;;  %v1667_v42 = vmax.f32 %v1665_v37, %v1657_v33 }
 0x1c9   :  { %v1664_v41 = vmax.f32 %v1643_v35, %v1649_v32 }
 0x1cb   :  { %v1666_v46 = vmax.f32 %v1664_v41, %v1655_v36 }
 0x1d1   :  { %v2068_v39 = vpop.eup %2067 }
 0x1d2   :  { %v1663_v40 = vmul.f32 0.6931472, %v2068_v39 }
 0x1d3   :  { %v2070_v44 = vpop.eup %2069 }
 0x1d4   :  { %v1661_v45 = vmul.f32 0.6931472, %v2070_v44  ;;  %v1669_v47 = vmax.f32 %v1667_v42, %v1663_v40 }
 0x1d6   :  { %v1668_v50 = vmax.f32 %v1666_v46, %v1661_v45  ;;  %v1671_v54 = vsel %vm40_vm0, %v1669_v47, -inf }
 0x1d8   :  { %v1670_v52 = vsel %vm40_vm0, %v1668_v50, -inf }
 0x1d9   :  { %v1672_v56 = vmax.f32 %v1670_v52, %v1671_v54 }
 0x1db   :  { %1673 = vmax.xlane.f32.xlu0 %v1672_v56 }
 0x1ec   :  { %s2407_s1 = spop %2048 }
 0x1ed   :  { %s129_s18 = smul.f32 0.00048828125, %s2407_s1 }
 0x264   :  { %v1674_v58 = vpop.xlane.xlu0 %1673 }
 0x265   :  { %v1675_v59 = vrot.slane %v1674_v58, 4 }
 0x267   :  { %v1676_v60 = vmax.f32 %v1674_v58, %v1675_v59 }
 0x269   :  { %v1677_v63 = vrot.slane %v1676_v60, 2 }
 0x26b   :  { %v1678_v1 = vmax.f32 %v1676_v60, %v1677_v63 }
 0x26d   :  { %v1679_v2 = vrot.slane %v1678_v1, 1 }
 0x26f   :  { %v1680_v3 = vmax.f32 %v1678_v1, %v1679_v2 }
 0x271   :  { %2050 = vpush %v1680_v3 }
 0x2a2   :  { %s2051_s17 = spop %2050 }
 0x2a3   :  { %v1682_v4 = vstv %s2051_s17 }
 0x2a4   :  { %2071 = vrcp.f32 %v1682_v4 }
 0x2b1   :  { %v2072_v5 = vpop.eup %2071 }
 0x2b2   :  { %v1684_v6 = vmul.f32 %v2072_v5, %v1643_v35  ;;  %v1685_v7 = vmul.f32 %v2072_v5, %v1645_v30  ;;  %v1698_v8 = vmul.f32 %v2072_v5, %v1649_v32  ;;  %v1699_v9 = vmul.f32 %v2072_v5, %v1651_v28 }
 0x2b3   :  { %v1712_v10 = vmul.f32 %v2072_v5, %v1655_v36  ;;  %v1713_v11 = vmul.f32 %v2072_v5, %v1657_v33  ;;  %v1726_v12 = vmul.f32 %v2072_v5, %v1661_v45  ;;  %v1727_v13 = vmul.f32 %v2072_v5, %v1663_v40 }
 0x2b4   :  { %vm1686_vm1 = vcmp.ne.f32.partialorder %v1684_v6, %v1684_v6  ;;  %vm1687_vm2 = vcmp.ne.f32.partialorder %v1685_v7, %v1685_v7  ;;  %vm1700_vm3 = vcmp.ne.f32.partialorder %v1698_v8, %v1698_v8  ;;  %vm1701_vm4 = vcmp.ne.f32.partialorder %v1699_v9, %v1699_v9 }
 0x2b5   :  { %v1688_v14 = vsel %vm1686_vm1, 0.0, %v1684_v6  ;;  %v1689_v15 = vsel %vm1687_vm2, 0.0, %v1685_v7  ;;  %v1702_v16 = vsel %vm1700_vm3, 0.0, %v1698_v8  ;;  %v1703_v17 = vsel %vm1701_vm4, 0.0, %v1699_v9 }
 0x2b6   :  { %v1690_v19 = vmax.f32 %v1688_v14, 0.0  ;;  %v1691_v20 = vmax.f32 %v1689_v15, 0.0  ;;  %v1704_v22 = vmax.f32 %v1702_v16, 0.0  ;;  %v1705_v23 = vmax.f32 %v1703_v17, 0.0 }
 0x2b7   :  { %vm1714_vm5 = vcmp.ne.f32.partialorder %v1712_v10, %v1712_v10  ;;  %vm1715_vm6 = vcmp.ne.f32.partialorder %v1713_v11, %v1713_v11  ;;  %vm1728_vm7 = vcmp.ne.f32.partialorder %v1726_v12, %v1726_v12  ;;  %vm1729_vm8 = vcmp.ne.f32.partialorder %v1727_v13, %v1727_v13 }
 0x2b8   :  { %v1692_v24 = vmin.f32 %v1690_v19, 1.0  ;;  %v1693_v25 = vmin.f32 %v1691_v20, 1.0  ;;  %v1706_v26 = vmin.f32 %v1704_v22, 1.0  ;;  %v1707_v27 = vmin.f32 %v1705_v23, 1.0 }
 0x2b9   :  { %v1716_v28 = vsel %vm1714_vm5, 0.0, %v1712_v10  ;;  %v1717_v29 = vsel %vm1715_vm6, 0.0, %v1713_v11  ;;  %v1730_v30 = vsel %vm1728_vm7, 0.0, %v1726_v12  ;;  %v1731_v31 = vsel %vm1729_vm8, 0.0, %v1727_v13 }
 0x2ba   :  { %v1694_v32 = vmul.f32 %v1692_v24, %v2390_v62  ;;  %v1695_v33 = vmul.f32 %v1693_v25, %v2381_v48  ;;  %v1708_v34 = vmul.f32 %v1706_v26, %v2385_v57  ;;  %v1709_v35 = vmul.f32 %v1707_v27, %v2383_v53 }
 0x2bb   :  { %v1718_v36 = vmax.f32 %v1716_v28, 0.0  ;;  %v1719_v37 = vmax.f32 %v1717_v29, 0.0  ;;  %v1732_v38 = vmax.f32 %v1730_v30, 0.0  ;;  %v1733_v39 = vmax.f32 %v1731_v31, 0.0 }
 0x2bc   :  { %v1710_v40 = vadd.f32 %v1708_v34, %v1694_v32  ;;  %v1711_v41 = vadd.f32 %v1709_v35, %v1695_v33 }
 0x2bd   :  { %v1720_v42 = vmin.f32 %v1718_v36, 1.0  ;;  %v1721_v43 = vmin.f32 %v1719_v37, 1.0  ;;  %v1734_v44 = vmin.f32 %v1732_v38, 1.0  ;;  %v1735_v45 = vmin.f32 %v1733_v39, 1.0 }
 0x2bf   :  { %v1722_v46 = vmul.f32 %v1720_v42, %v2393_v0  ;;  %v1723_v62 = vmul.f32 %v1721_v43, %v2388_v61  ;;  %v1736_v57 = vmul.f32 %v1734_v44, %v2402_v21  ;;  %v1737_v53 = vmul.f32 %v1735_v45, %v2399_v18 }
 0x2c0   :  { %v130_v21 = vstv %s129_s18 }
 0x2c1   :  { %v1724_v47 = vadd.f32 %v1722_v46, %v1710_v40  ;;  %v1725_v48 = vadd.f32 %v1723_v62, %v1711_v41  ;;  %2073 = vrsqrt.f32 %v130_v21  ;;  %vm133_vm9 = vcmp.eq.f32.partialorder %v130_v21, inf }
 0x2c2   :  { %v136_v1 = vand.u32 2147483648, %v130_v21  ;;  %vm135_vm10 = vcmp.eq.f32.partialorder %v130_v21, 0.0 }
 0x2c3   :  { %v1738_v49 = vadd.f32 %v1736_v57, %v1724_v47  ;;  %v1739_v50 = vadd.f32 %v1737_v53, %v1725_v48 }
 0x2c5   :  { %v1740_v51 = vsel %vm40_vm0, %v1738_v49, 0.0  ;;  %v1741_v52 = vsel %vm40_vm0, %v1739_v50, 0.0 }
 0x2c6   :  { %v1742_v54 = vadd.f32 %v1741_v52, %v1740_v51 }
 0x2c8   :  { %1743 = vadd.xlane.f32.xlu1 %v1742_v54 }
 0x2ce   :  { %v2074_v18 = vpop.eup %2073 }
 0x2cf   :  { %v132_v63 = vmul.f32 %v2074_v18, %v130_v21 }
 0x2d1   :  { %v134_v2 = vsel %vm133_vm9, %v130_v21, %v132_v63 }
 0x2d2   :  { %v137_v5 = vsel %vm135_vm10, %v136_v1, %v134_v2 }
 0x351   :  { %v1744_v55 = vpop.xlane.xlu1 %1743 }
 0x352   :  { %v1745_v56 = vrot.slane %v1744_v55, 4 }
 0x354   :  { %v1746_v0 = vadd.f32 %v1745_v56, %v1744_v55 }
 0x356   :  { %v1747_v58 = vrot.slane %v1746_v0, 2 }
 0x358   :  { %v1748_v61 = vadd.f32 %v1747_v58, %v1746_v0 }
 0x35a   :  { %v1749_v59 = vrot.slane %v1748_v61, 1 }
 0x35c   :  { %v1750_v60 = vadd.f32 %v1749_v59, %v1748_v61 }
 0x35e   :  { %2052 = vpush %v1750_v60 }
 0x38f   :  { %s2053_s19 = spop %2052 }
 0x390   :  { %s1752_s20 = smul.f32 0.0009765625, %s2053_s19 }
 0x392   :  { %v1753_v3 = vstv %s1752_s20 }
 0x393   :  { %v1754_v4 = vmul.f32 0.49, %v1753_v3 }
 0x395   :  { %v1755_v6 = vadd.f32 %v1754_v4, %v137_v5 }
 0x397   :  { %1757 = vst.msk [vmem:[#allocation2] sm:$0x1] %vm1756_vm11, %v1755_v6 }
 0x398   :  { %2086 = shalt.err (!%p2083_p4)
}
 0x399   :  { %1767 = dma.vmem_to_hbm [thread:$0]  %s1765_s22, 16, %s2429_s6, [#allocation3]  }
 0x39a   :  { %2095 = dma.done.wait [#allocation3], 16  }
 0x39b   :  { %2096 = vsyncadd [#allocation3], 4294967280 }
 0x39c   :  { %1771 = vsyncpa [#allocation3], 1 }

</bundles_post_ra>
